<compile_context>
chip_gen: v5e
topology: v5e:2x2
jax: 0.10.0
libtpu: 0.0.40
codegen_flags: <defaults>
</compile_context>

<pallas_src>
import functools
from itertools import cycle

import jax
import jax.numpy as jnp
from jax.experimental import pallas as pl
from jax.experimental.pallas import tpu as pltpu


def take(iterator, howmany):
    return [el for el, _ in zip(cycle(iterator), range(howmany))]


# ----------------------------------------------------------------------------
# Pallas kernel: whole SympNet forward for one batch tile, natural row layout
# (batch rows on sublanes, the 2*dim feature axis on lanes).
# ----------------------------------------------------------------------------
def sympnet_kernel(x_ref, M_ref, b_ref, W_ref, out_ref, *, n_layers):
    X = x_ref[...]                                   # (tb, 2*dim) f32

    for l in range(n_layers):                        # unrolled at trace time
        # ---- fused LinearStack + bias:  X <- X @ M_l + b_l  (one matmul) ----
        X = jnp.dot(X, M_ref[l], preferred_element_type=jnp.float32) + b_ref[l]

        # ---- Activation (the last one is deleted in SympNet.__init__) ----
        # q += a*tanh(p)  (or p += a*tanh(q))  as  X += tanh(X) @ W_l, where
        # W_l scatters a*tanh(source half) into the destination half and is
        # zero elsewhere, so the other half gets an exactly-zero update.
        if l < n_layers - 1:
            X = X + jnp.dot(jnp.tanh(X), W_ref[l],
                            preferred_element_type=jnp.float32)

    out_ref[...] = X                                 # masked on the ragged tile


# ----------------------------------------------------------------------------
# Host-side parameter fusion (one-time setup, not per-forward work):
#   * each LinearStack (all sublayers + biases) -> one (2*dim, 2*dim) matrix
#     M_l (row convention, X_new = X @ M_l) and a (1, 2*dim) bias row,
#   * each Activation -> a (2*dim, 2*dim) scatter matrix W_l = P . diag(a).
# ----------------------------------------------------------------------------
def build_fused_params(A_all, bp, bq, a_all, *, dim, n_layers, n_sub):
    sub_kinds = take(["upper", "lower"], n_sub)
    act_kinds = take(["upper", "lower"], n_layers)
    I = jnp.eye(dim, dtype=jnp.float32)
    Z = jnp.zeros((dim, dim), dtype=jnp.float32)

    Ms = []
    for l in range(n_layers):
        M = jnp.eye(2 * dim, dtype=jnp.float32)
        for s, kind in enumerate(sub_kinds):
            A = A_all[l, s]
            S = A + A.T
            if kind == "upper":        # [p, q] -> [p + q S, q] = [p, q] @ [[I,0],[S,I]]
                Msub = jnp.block([[I, Z], [S, I]])
            else:                      # [p, q] -> [p, q + p S] = [p, q] @ [[I,S],[0,I]]
                Msub = jnp.block([[I, S], [Z, I]])
            M = M @ Msub               # sublayers applied left-to-right
        Ms.append(M)
    M_all = jnp.stack(Ms)                                     # (L, 2d, 2d)

    b_all = jnp.concatenate([bp, bq], axis=-1)[:, None, :]    # (L, 1, 2d)

    Ws = []
    for l in range(max(n_layers - 1, 1)):                     # guard n_layers == 1
        if l < n_layers - 1:
            Da = jnp.diag(a_all[l])
            if act_kinds[l] == "upper":     # p += a * tanh(q): source q -> dest p
                W = jnp.block([[Z, Z], [Da, Z]])
            else:                           # lower: q += a * tanh(p)
                W = jnp.block([[Z, Da], [Z, Z]])
        else:
            W = jnp.zeros((2 * dim, 2 * dim), dtype=jnp.float32)  # dummy, never read
        Ws.append(W)
    W_all = jnp.stack(Ws)                                     # (max(L-1,1), 2d, 2d)

    return M_all, b_all, W_all


# ----------------------------------------------------------------------------
# Batch-tile sizing: biggest multiple-of-128 row tile with an EVEN number of
# grid steps (>= 2) so v7x megacore sharding never leaves a TensorCore idle;
# capped at 1024 rows (per-step slab ~256 KiB, VMEM is never the limiter).
# ----------------------------------------------------------------------------
def pick_tb(B, cap=1024):
    if B <= 256:
        return int(B)                       # one full-array tile (always legal)
    steps = max(2, 2 * pl.cdiv(pl.cdiv(B, cap), 2))
    return int(pl.cdiv(pl.cdiv(B, steps), 128) * 128)


# ----------------------------------------------------------------------------
# Wrapper: natural layout in/out, ragged last tile, no host transpose/pad.
# ----------------------------------------------------------------------------
def sympnet_forward(x, M_all, b_all, W_all, *, dim, n_layers, tb=None):
    x = jnp.atleast_2d(x).astype(jnp.float32)
    B, two_d = x.shape
    assert two_d == 2 * dim
    if tb is None:
        tb = pick_tb(B)
    n_act_blk = W_all.shape[0]

    kernel = functools.partial(sympnet_kernel, n_layers=n_layers)

    cost = pl.CostEstimate(
        flops=int((2 * n_layers - 1) * 2 * B * (2 * dim) ** 2),
        transcendentals=int(max(n_layers - 1, 0) * B * 2 * dim),
        bytes_accessed=int(4 * (2 * B * 2 * dim
                                + M_all.size + b_all.size + W_all.size)),
    )

    out = pl.pallas_call(
        kernel,
        out_shape=jax.ShapeDtypeStruct((B, 2 * dim), jnp.float32),
        grid=(pl.cdiv(B, tb),),                      # ragged last tile, no pad
        in_specs=[
            # X tile in natural layout; block spans the full feature axis so the
            # HBM transfer per step is one fully contiguous slab.
            # (v5e option: pipeline_mode=pl.Buffered(3) to hide DMA jitter.)
            pl.BlockSpec((tb, 2 * dim), lambda i: (i, 0)),
            # Tiny parameters: constant index maps -> VMEM-resident across steps.
            pl.BlockSpec((n_layers, 2 * dim, 2 * dim), lambda i: (0, 0, 0)),
            pl.BlockSpec((n_layers, 1, 2 * dim), lambda i: (0, 0, 0)),
            pl.BlockSpec((n_act_blk, 2 * dim, 2 * dim), lambda i: (0, 0, 0)),
        ],
        out_specs=pl.BlockSpec((tb, 2 * dim), lambda i: (i, 0)),
        compiler_params=pltpu.CompilerParams(
            dimension_semantics=("parallel",)),
        cost_estimate=cost,
    )(x, M_all, b_all, W_all)
    return out


# ----------------------------------------------------------------------------
# Pure-JAX reference (mirrors the PyTorch forward, sequential sublayers).
# ----------------------------------------------------------------------------
def sympnet_reference(x, A_all, bp, bq, a_all, *, dim, n_layers, n_sub):
    sub_kinds = take(["upper", "lower"], n_sub)
    act_kinds = take(["upper", "lower"], n_layers)
    p, q = x[:, :dim], x[:, dim:]
    for l in range(n_layers):
        for s, kind in enumerate(sub_kinds):
            A = A_all[l, s]
            S = A + A.T
            if kind == "upper":
                p = p + q @ S
            else:
                q = q + p @ S
        p = p + bp[l]
        q = q + bq[l]
        if l < n_layers - 1:
            if act_kinds[l] == "lower":
                q = q + a_all[l] * jnp.tanh(p)
            else:
                p = p + a_all[l] * jnp.tanh(q)
    return jnp.concatenate([p, q], axis=1)


if __name__ == "__main__":
    # Small deterministic configuration matching the module's structure.
    dim = 32
    n_layers = 3
    n_linear_sublayers = 2
    B = 1000          # not a multiple of the tile -> exercises the ragged tile
                      # (pick_tb -> tb=512, grid=(2,): even, both v7x TCs busy)

    key = jax.random.PRNGKey(0)
    k_x, k_A, k_bp, k_bq, k_a = jax.random.split(key, 5)

    # Parameters (torch.nn.init.normal_ -> standard normal), stacked per layer.
    A_all = jax.random.normal(
        k_A, (n_layers, n_linear_sublayers, dim, dim), dtype=jnp.float32)
    bp = jax.random.normal(k_bp, (n_layers, dim), dtype=jnp.float32)
    bq = jax.random.normal(k_bq, (n_layers, dim), dtype=jnp.float32)
    a_all = jax.random.normal(k_a, (n_layers - 1, dim), dtype=jnp.float32)

    # Input: (B, 2*dim) -- p|q concatenated along the feature axis.
    x = jax.random.normal(k_x, (B, 2 * dim), dtype=jnp.float32)

    # One-time parameter fusion (setup, not per-forward work).
    M_all, b_all, W_all = build_fused_params(
        A_all, bp, bq, a_all,
        dim=dim, n_layers=n_layers, n_sub=n_linear_sublayers)

    out = sympnet_forward(x, M_all, b_all, W_all, dim=dim, n_layers=n_layers)
    out = jax.block_until_ready(out)

    ref = sympnet_reference(
        x, A_all, bp, bq, a_all,
        dim=dim, n_layers=n_layers, n_sub=n_linear_sublayers)

    assert out.shape == (B, 2 * dim)
    # The fused matmul changes f32 summation order vs. the sequential
    # reference, so compare relative to the overall output scale.
    scale = float(jnp.max(jnp.abs(ref))) + 1e-30
    rel_err = float(jnp.max(jnp.abs(out - ref))) / scale
    assert rel_err < 1e-4, rel_err

    print("KERNEL_OK")
</pallas_src>

<mosaic_0001>
module attributes {stable_mosaic.version = 11 : i64} {
  func.func @sympnet_kernel(%arg0: i32, %arg1: memref<512x64xf32, #tpu.memory_space<vmem>>, %arg2: memref<3x64x64xf32, #tpu.memory_space<vmem>>, %arg3: memref<3x1x64xf32, #tpu.memory_space<vmem>>, %arg4: memref<2x64x64xf32, #tpu.memory_space<vmem>>, %arg5: memref<512x64xf32, #tpu.memory_space<vmem>>) attributes {dimension_semantics = [#tpu.dimension_semantics<parallel>], iteration_bounds = array<i64: 2>, scalar_prefetch = 0 : i64, scratch_operands = 0 : i64, tpu.core_type = #tpu.core_type<tc>, window_params = [{transform_indices = @transform_0, window_bounds = array<i64: 512, 64>}, {pipeline_mode = #tpu.pipeline_mode<synchronous>, transform_indices = @transform_1, window_bounds = array<i64: 3, 64, 64>}, {pipeline_mode = #tpu.pipeline_mode<synchronous>, transform_indices = @transform_2, window_bounds = array<i64: 3, 1, 64>}, {pipeline_mode = #tpu.pipeline_mode<synchronous>, transform_indices = @transform_3, window_bounds = array<i64: 2, 64, 64>}, {transform_indices = @transform_4, window_bounds = array<i64: 512, 64>}]} {
    %c0 = arith.constant 0 : index
    %c0_0 = arith.constant 0 : index
    %0 = vector.load %arg1[%c0, %c0_0] : memref<512x64xf32, #tpu.memory_space<vmem>>, vector<512x64xf32>
    %c0_1 = arith.constant 0 : index
    %c0_2 = arith.constant 0 : index
    %c0_3 = arith.constant 0 : index
    %1 = vector.load %arg2[%c0_1, %c0_2, %c0_3] : memref<3x64x64xf32, #tpu.memory_space<vmem>>, vector<1x64x64xf32>
    %2 = vector.shape_cast %1 : vector<1x64x64xf32> to vector<64x64xf32>
    %cst = arith.constant dense<0.000000e+00> : vector<512x64xf32>
    %3 = tpu.matmul %0, %2, %cst {dimension_numbers = #tpu.dot_dimension_numbers<[1], [0], [0], [1], [0, 0, 1, 1], [], []>} : vector<512x64xf32>, vector<64x64xf32>, vector<512x64xf32> -> vector<512x64xf32>
    %c0_4 = arith.constant 0 : index
    %c0_5 = arith.constant 0 : index
    %c0_6 = arith.constant 0 : index
    %4 = vector.load %arg3[%c0_4, %c0_5, %c0_6] : memref<3x1x64xf32, #tpu.memory_space<vmem>>, vector<1x1x64xf32>
    %5 = vector.shape_cast %4 : vector<1x1x64xf32> to vector<1x64xf32>
    %6 = vector.broadcast %5 : vector<1x64xf32> to vector<512x64xf32>
    %7 = arith.addf %3, %6 : vector<512x64xf32>
    %8 = math.tanh %7 : vector<512x64xf32>
    %c0_7 = arith.constant 0 : index
    %c0_8 = arith.constant 0 : index
    %c0_9 = arith.constant 0 : index
    %9 = vector.load %arg4[%c0_7, %c0_8, %c0_9] : memref<2x64x64xf32, #tpu.memory_space<vmem>>, vector<1x64x64xf32>
    %10 = vector.shape_cast %9 : vector<1x64x64xf32> to vector<64x64xf32>
    %cst_10 = arith.constant dense<0.000000e+00> : vector<512x64xf32>
    %11 = tpu.matmul %8, %10, %cst_10 {dimension_numbers = #tpu.dot_dimension_numbers<[1], [0], [0], [1], [0, 0, 1, 1], [], []>} : vector<512x64xf32>, vector<64x64xf32>, vector<512x64xf32> -> vector<512x64xf32>
    %12 = arith.addf %7, %11 : vector<512x64xf32>
    %c1 = arith.constant 1 : index
    %c0_11 = arith.constant 0 : index
    %c0_12 = arith.constant 0 : index
    %13 = vector.load %arg2[%c1, %c0_11, %c0_12] : memref<3x64x64xf32, #tpu.memory_space<vmem>>, vector<1x64x64xf32>
    %14 = vector.shape_cast %13 : vector<1x64x64xf32> to vector<64x64xf32>
    %cst_13 = arith.constant dense<0.000000e+00> : vector<512x64xf32>
    %15 = tpu.matmul %12, %14, %cst_13 {dimension_numbers = #tpu.dot_dimension_numbers<[1], [0], [0], [1], [0, 0, 1, 1], [], []>} : vector<512x64xf32>, vector<64x64xf32>, vector<512x64xf32> -> vector<512x64xf32>
    %c1_14 = arith.constant 1 : index
    %c0_15 = arith.constant 0 : index
    %c0_16 = arith.constant 0 : index
    %16 = vector.load %arg3[%c1_14, %c0_15, %c0_16] : memref<3x1x64xf32, #tpu.memory_space<vmem>>, vector<1x1x64xf32>
    %17 = vector.shape_cast %16 : vector<1x1x64xf32> to vector<1x64xf32>
    %18 = vector.broadcast %17 : vector<1x64xf32> to vector<512x64xf32>
    %19 = arith.addf %15, %18 : vector<512x64xf32>
    %20 = math.tanh %19 : vector<512x64xf32>
    %c1_17 = arith.constant 1 : index
    %c0_18 = arith.constant 0 : index
    %c0_19 = arith.constant 0 : index
    %21 = vector.load %arg4[%c1_17, %c0_18, %c0_19] : memref<2x64x64xf32, #tpu.memory_space<vmem>>, vector<1x64x64xf32>
    %22 = vector.shape_cast %21 : vector<1x64x64xf32> to vector<64x64xf32>
    %cst_20 = arith.constant dense<0.000000e+00> : vector<512x64xf32>
    %23 = tpu.matmul %20, %22, %cst_20 {dimension_numbers = #tpu.dot_dimension_numbers<[1], [0], [0], [1], [0, 0, 1, 1], [], []>} : vector<512x64xf32>, vector<64x64xf32>, vector<512x64xf32> -> vector<512x64xf32>
    %24 = arith.addf %19, %23 : vector<512x64xf32>
    %c2 = arith.constant 2 : index
    %c0_21 = arith.constant 0 : index
    %c0_22 = arith.constant 0 : index
    %25 = vector.load %arg2[%c2, %c0_21, %c0_22] : memref<3x64x64xf32, #tpu.memory_space<vmem>>, vector<1x64x64xf32>
    %26 = vector.shape_cast %25 : vector<1x64x64xf32> to vector<64x64xf32>
    %cst_23 = arith.constant dense<0.000000e+00> : vector<512x64xf32>
    %27 = tpu.matmul %24, %26, %cst_23 {dimension_numbers = #tpu.dot_dimension_numbers<[1], [0], [0], [1], [0, 0, 1, 1], [], []>} : vector<512x64xf32>, vector<64x64xf32>, vector<512x64xf32> -> vector<512x64xf32>
    %c2_24 = arith.constant 2 : index
    %c0_25 = arith.constant 0 : index
    %c0_26 = arith.constant 0 : index
    %28 = vector.load %arg3[%c2_24, %c0_25, %c0_26] : memref<3x1x64xf32, #tpu.memory_space<vmem>>, vector<1x1x64xf32>
    %29 = vector.shape_cast %28 : vector<1x1x64xf32> to vector<1x64xf32>
    %30 = vector.broadcast %29 : vector<1x64xf32> to vector<512x64xf32>
    %31 = arith.addf %27, %30 : vector<512x64xf32>
    %c0_27 = arith.constant 0 : index
    %c0_28 = arith.constant 0 : index
    %32 = vector.load %arg5[%c0_27, %c0_28] : memref<512x64xf32, #tpu.memory_space<vmem>>, vector<512x64xf32>
    tpu.vector_store %arg5[%c0_27, %c0_28], %31 {strides = array<i32>} : memref<512x64xf32, #tpu.memory_space<vmem>>, vector<512x64xf32>,
    return
  }
  func.func @transform_0(%arg0: i32) -> (i32, i32) {
    %c0_i32 = arith.constant 0 : i32
    %c0_i32_0 = arith.constant 0 : i32
    return %arg0, %c0_i32 : i32, i32
  }
  func.func @transform_1(%arg0: i32) -> (i32, i32, i32) {
    %c0_i32 = arith.constant 0 : i32
    %c0_i32_0 = arith.constant 0 : i32
    %c0_i32_1 = arith.constant 0 : i32
    %c0_i32_2 = arith.constant 0 : i32
    return %c0_i32, %c0_i32_0, %c0_i32_1 : i32, i32, i32
  }
  func.func @transform_2(%arg0: i32) -> (i32, i32, i32) {
    %c0_i32 = arith.constant 0 : i32
    %c0_i32_0 = arith.constant 0 : i32
    %c0_i32_1 = arith.constant 0 : i32
    %c0_i32_2 = arith.constant 0 : i32
    return %c0_i32, %c0_i32_0, %c0_i32_1 : i32, i32, i32
  }
  func.func @transform_3(%arg0: i32) -> (i32, i32, i32) {
    %c0_i32 = arith.constant 0 : i32
    %c0_i32_0 = arith.constant 0 : i32
    %c0_i32_1 = arith.constant 0 : i32
    %c0_i32_2 = arith.constant 0 : i32
    return %c0_i32, %c0_i32_0, %c0_i32_1 : i32, i32, i32
  }
  func.func @transform_4(%arg0: i32) -> (i32, i32) {
    %c0_i32 = arith.constant 0 : i32
    %c0_i32_0 = arith.constant 0 : i32
    return %arg0, %c0_i32 : i32, i32
  }
}

</mosaic_0001>

<bundles_post_ra>
// kernel: tpu_custom_call.1
= control target key start
LH: loop header
LB: loop body
LE: loop exit
PB: predicated region body
PF: predicated region fallthrough
CT: control target
= control target key end

     0   :  { %s3866_s15 = smov 0   ;;  %s3868_s16 = smov 0   ;;  %s5551_s0 = inlined_call_operand.vmem [shape: f32[1000,64], index: 0, kind: input, shape index: {}]   ;;  %s5552_s1 = inlined_call_operand.vmem [shape: f32[3,64,64], index: 1, kind: input, shape index: {}]   ;;  %s5553_s2 = inlined_call_operand.vmem [shape: f32[3,1,64], index: 2, kind: input, shape index: {}]   ;;  %s5554_s3 = inlined_call_operand.vmem [shape: f32[2,64,64], index: 3, kind: input, shape index: {}]   ;;  %s5555_s4 = inlined_call_operand.vmem [shape: f32[1000,64], index: 4, kind: output, shape index: {}]  }
   0x1   :  { %s3870_s17 = smov 0  }
   0x2 LB: > { %s3879_s18 = sadd.s32 4294967295, %s3807_s17   ;;  %s3881_s19 = sadd.s32 1, %s3807_s17   ;;  %s3807_s17 = sphi %s3870_s17, %s5564_s17   ;;  %s3803_s16 = sphi %s3868_s16, %s5563_s16   ;;  %s3799_s15 = sphi %s3866_s15, %s5562_s15  }
   0x3   : > { %s107_s20 = ssub.s32 %s3807_s17, %s3881_s19  ;;  %s110_s21 = sadd.s32 1, %s3803_s16 }
   0x4   : > { %p108_p0 = scmp.eq.s32.totalorder %s107_s20, 0  ;;  %p120_p1 = scmp.ne.s32.totalorder %s3803_s16, %s3799_s15 }
   0x5   : > { %p121_p2 = scmp.eq.s32.totalorder %s3879_s18, 1  ;;  %p3009_p3 = scmp.ge.s32.totalorder %s3807_s17, 1 }
   0x6   : > { %s3889_s22 = scalar_select %p108_p0, %s3803_s16, %s110_s21  }
   0x7   : > { %p3891_p4 = por %p121_p2, %p120_p1  ;;  %p171_p5 = scmp.lt.s32.totalorder %s3807_s17, 3 }
   0x9   : > { %p172_p6 = pnand %p3009_p3, %p171_p5 }
   0xa   : > { %s3902_s28 = sshll.u32 (!%p172_p6), %s3879_s18, 6  ;;  %s197_s17 = sand.u32 (!%p172_p6), 1, %s3799_s15  }
   0xb   : > { %175 = sbr.rel (%p172_p6) target bundleno = 1267 (0x4f3), region = 36  ;;  %p205_p7 = scmp.lt.s32.totalorder (!%p172_p6), %s3902_s28, 124 }
   0xc   : > { %s3010_s20 = sshll.u32 (!%p172_p6), %s197_s17, 9 }
   0xd   : > { %s4943_s15 = scalar_lea.vmem (!%p172_p6), [#allocation2], %s3010_s20  }
  0x10   : > { %v290_v0 = vld [vmem:[%s5552_s1 + $0x38] sm:$0xff]  ;;  %v289_v1 = vld [vmem:[%s5552_s1 + $0x30] sm:$0xff]  ;;  %v288_v2 = vld [vmem:[%s5552_s1 + $0x28] sm:$0xff]  ;;  %s206_s5 = scalar_select %p205_p7, %s3902_s28, 124  ;;  %vm295_vm0 = vcmask 523264  }
  0x11   : > { %496 = vmatpush.msra.mxu0 %v290_v0  ;;  %3379 = vmatpush.msra.mxu1 %v290_v0  ;;  %v287_v3 = vld [vmem:[%s5552_s1 + $0x20] sm:$0xff]  ;;  %v286_v4 = vld [vmem:[%s5552_s1 + $0x18] sm:$0xff]  ;;  %v285_v5 = vld [vmem:[%s5552_s1 + $0x10] sm:$0xff]  ;;  %s3376_s6 = sshll.u32 (%p3891_p4), %s3879_s18, 9 }
  0x12   : > { %3380 = vmatpush.msra.mxu2 %v290_v0  ;;  %3381 = vmatpush.msra.mxu3 %v290_v0  ;;  %s3012_s10 = sshll.u32 %s206_s5, 3  ;;  %v284_v6 = vld [vmem:[%s5552_s1 + $0x8] sm:$0xff]  ;;  %v283_v7 = vld [vmem:[%s5552_s1] sm:$0xff]  ;;  %v768_v10 = vld [vmem:[%s5554_s3 + $0x38] sm:$0xff]  ;;  %s2674_s5 = ssub.s32 (%p3891_p4), 125, %s3902_s28 }
  0x13   : > { %497 = vmatpush.msra.mxu0 %v289_v1  ;;  %3382 = vmatpush.msra.mxu1 %v289_v1  ;;  %s3924_s21 = scalar_lea.vmem %s5551_s0, %s3012_s10  ;;  %v767_v11 = vld [vmem:[%s5554_s3 + $0x30] sm:$0xff]  ;;  %v766_v12 = vld [vmem:[%s5554_s3 + $0x28] sm:$0xff]  ;;  %v765_v17 = vld [vmem:[%s5554_s3 + $0x20] sm:$0xff]  ;;  %p2675_p8 = scmp.lt.s32.totalorder (%p3891_p4), %s2674_s5, 64 }
  0x14   : > { %3383 = vmatpush.msra.mxu2 %v289_v1  ;;  %3384 = vmatpush.msra.mxu3 %v289_v1  ;;  %v219_v8 = vld [vmem:[%s3924_s21] sm:$0xff]  ;;  %v220_v13 = vld [vmem:[%s3924_s21 + $0x8] sm:$0xff]  ;;  %v221_v15 = vld [vmem:[%s3924_s21 + $0x10] sm:$0xff]  ;;  %s5416_s9 = scalar_lea.vmem (%p3891_p4), %s5555_s4, %s3376_s6  }
  0x15   : > { %498 = vmatpush.msra.mxu0 %v288_v2  ;;  %3385 = vmatpush.msra.mxu1 %v288_v2  ;;  %v235_v9 = vld [vmem:[%s3924_s21 + $0x80] sm:$0xff]  ;;  %v236_v14 = vld [vmem:[%s3924_s21 + $0x88] sm:$0xff]  ;;  %v237_v16 = vld [vmem:[%s3924_s21 + $0x90] sm:$0xff] }
  0x16   : > { %3386 = vmatpush.msra.mxu2 %v288_v2  ;;  %3387 = vmatpush.msra.mxu3 %v288_v2  ;;  %v222_v18 = vld [vmem:[%s3924_s21 + $0x18] sm:$0xff]  ;;  %v223_v20 = vld [vmem:[%s3924_s21 + $0x20] sm:$0xff]  ;;  %v224_v23 = vld [vmem:[%s3924_s21 + $0x28] sm:$0xff] }
  0x17   : > { %499 = vmatpush.msra.mxu0 %v287_v3  ;;  %3388 = vmatpush.msra.mxu1 %v287_v3  ;;  %v238_v19 = vld [vmem:[%s3924_s21 + $0x98] sm:$0xff]  ;;  %v239_v21 = vld [vmem:[%s3924_s21 + $0xa0] sm:$0xff]  ;;  %v240_v24 = vld [vmem:[%s3924_s21 + $0xa8] sm:$0xff] }
  0x18   : > { %3389 = vmatpush.msra.mxu2 %v287_v3  ;;  %3390 = vmatpush.msra.mxu3 %v287_v3  ;;  %v764_v22 = vld [vmem:[%s5554_s3 + $0x18] sm:$0xff]  ;;  %v225_v25 = vld [vmem:[%s3924_s21 + $0x30] sm:$0xff]  ;;  %v227_v30 = vld [vmem:[%s3924_s21 + $0x40] sm:$0xff] }
  0x19   : > { %500 = vmatpush.msra.mxu0 %v286_v4  ;;  %3391 = vmatpush.msra.mxu1 %v286_v4  ;;  %v241_v26 = vld [vmem:[%s3924_s21 + $0xb0] sm:$0xff]  ;;  %v226_v28 = vld [vmem:[%s3924_s21 + $0x38] sm:$0xff]  ;;  %v243_v31 = vld [vmem:[%s3924_s21 + $0xc0] sm:$0xff] }
  0x1a   : > { %3392 = vmatpush.msra.mxu2 %v286_v4  ;;  %3393 = vmatpush.msra.mxu3 %v286_v4  ;;  %v763_v27 = vld [vmem:[%s5554_s3 + $0x10] sm:$0xff]  ;;  %v242_v29 = vld [vmem:[%s3924_s21 + $0xb8] sm:$0xff]  ;;  %v762_v32 = vld [vmem:[%s5554_s3 + $0x8] sm:$0xff] }
  0x1b   : > { %501 = vmatpush.msra.mxu0 %v285_v5  ;;  %3394 = vmatpush.msra.mxu1 %v285_v5  ;;  %v228_v33 = vld [vmem:[%s3924_s21 + $0x48] sm:$0xff]  ;;  %v229_v35 = vld [vmem:[%s3924_s21 + $0x50] sm:$0xff]  ;;  %v761_v37 = vld [vmem:[%s5554_s3] sm:$0xff] }
  0x1c   : > { %3395 = vmatpush.msra.mxu2 %v285_v5  ;;  %3396 = vmatpush.msra.mxu3 %v285_v5  ;;  %v244_v34 = vld [vmem:[%s3924_s21 + $0xc8] sm:$0xff]  ;;  %v245_v36 = vld [vmem:[%s3924_s21 + $0xd0] sm:$0xff]  ;;  %v230_v38 = vld [vmem:[%s3924_s21 + $0x58] sm:$0xff] }
  0x1d   : > { %502 = vmatpush.msra.mxu0 %v284_v6  ;;  %3397 = vmatpush.msra.mxu1 %v284_v6  ;;  %v246_v39 = vld [vmem:[%s3924_s21 + $0xd8] sm:$0xff]  ;;  %v231_v40 = vld [vmem:[%s3924_s21 + $0x60] sm:$0xff]  ;;  %v232_v42 = vld [vmem:[%s3924_s21 + $0x68] sm:$0xff] }
  0x1e   : > { %3398 = vmatpush.msra.mxu2 %v284_v6  ;;  %3399 = vmatpush.msra.mxu3 %v284_v6  ;;  %v247_v41 = vld [vmem:[%s3924_s21 + $0xe0] sm:$0xff]  ;;  %v248_v43 = vld [vmem:[%s3924_s21 + $0xe8] sm:$0xff]  ;;  %v3148_v45 = vld [vmem:[%s5552_s1 + $0x78] sm:$0xff] }
  0x1f   : > { %503 = vmatpush.msra.mxu0 %v283_v7  ;;  %3400 = vmatpush.msra.mxu1 %v283_v7  ;;  %v251_v44 = vld [vmem:[%s3924_s21 + $0x100] sm:$0xff]  ;;  %v233_v46 = vld [vmem:[%s3924_s21 + $0x70] sm:$0xff]  ;;  %v252_v48 = vld [vmem:[%s3924_s21 + $0x108] sm:$0xff] }
  0x20   : > { %3013 = vmatmul.msk.f32.vlgmr.msra.gmra.mxu0 %vm295_vm0, %v219_v8  ;;  %3029 = vmatmul.msk.f32.vlgmr.msra.gmra.mxu1 %vm295_vm0, %v235_v9  ;;  %v249_v47 = vld [vmem:[%s3924_s21 + $0xf0] sm:$0xff]  ;;  %v234_v49 = vld [vmem:[%s3924_s21 + $0x78] sm:$0xff]  ;;  %v4032_v53 = vld [vmem:[%s5553_s2] ss:$0 sm:$0xff] }
  0x21   : > { %969 = vmatpush.msrb.mxu1 %v768_v10  ;;  %3401 = vmatpush.msra.mxu2 %v283_v7  ;;  %v250_v50 = vld [vmem:[%s3924_s21 + $0xf8] sm:$0xff]  ;;  %v253_v51 = vld [vmem:[%s3924_s21 + $0x110] sm:$0xff]  ;;  %v255_v62 = vld [vmem:[%s3924_s21 + $0x120] sm:$0xff] }
  0x22   : > { %3402 = vmatpush.msra.mxu3 %v283_v7  ;;  %3045 = vmatmul.msk.f32.vlgmr.msra.gmra.mxu2 %vm295_vm0, %v251_v44  ;;  %v3147_v52 = vld [vmem:[%s5552_s1 + $0x70] sm:$0xff]  ;;  %v254_v57 = vld [vmem:[%s3924_s21 + $0x118] sm:$0xff]  ;;  %v3146_v63 = vld [vmem:[%s5552_s1 + $0x68] sm:$0xff] }
  0x23   : > { %970 = vmatpush.msrb.mxu1 %v767_v11  ;;  %1448 = vmatpush.msrb.mxu2 %v3148_v45  ;;  %v256_v4 = vld [vmem:[%s3924_s21 + $0x128] sm:$0xff]  ;;  %v257_v9 = vld [vmem:[%s3924_s21 + $0x130] sm:$0xff]  ;;  %v3145_v10 = vld [vmem:[%s5552_s1 + $0x60] sm:$0xff] }
  0x25   : > { %971 = vmatpush.msrb.mxu1 %v766_v12  ;;  %1449 = vmatpush.msrb.mxu2 %v3147_v52 }
  0x27   : > { %972 = vmatpush.msrb.mxu1 %v765_v17  ;;  %1450 = vmatpush.msrb.mxu2 %v3146_v63 }
  0x28   : > { %3014 = vmatmul.msk.f32.gmra.mxu0 %vm295_vm0, %v220_v13  ;;  %3030 = vmatmul.msk.f32.gmra.mxu1 %vm295_vm0, %v236_v14 }
  0x29   : > { %973 = vmatpush.msrb.mxu1 %v764_v22  ;;  %1451 = vmatpush.msrb.mxu2 %v3145_v10 }
  0x2a   : > { %3046 = vmatmul.msk.f32.gmra.mxu2 %vm295_vm0, %v252_v48  ;;  %v264_v48 = vld [vmem:[%s3924_s21 + $0x168] sm:$0xff] }
  0x2b   : > { %974 = vmatpush.msrb.mxu1 %v763_v27 }
  0x2d   : > { %975 = vmatpush.msrb.mxu1 %v762_v32  ;;  %v3143_v32 = vld [vmem:[%s5552_s1 + $0x50] sm:$0xff] }
  0x2f   : > { %976 = vmatpush.msrb.mxu1 %v761_v37  ;;  %v262_v37 = vld [vmem:[%s3924_s21 + $0x158] sm:$0xff] }
  0x30   : > { %3015 = vmatmul.msk.f32.gmra.mxu0 %vm295_vm0, %v221_v15  ;;  %3031 = vmatmul.msk.f32.gmra.mxu1 %vm295_vm0, %v237_v16  ;;  %v258_v15 = vld [vmem:[%s3924_s21 + $0x138] sm:$0xff] }
  0x32   : > { %3047 = vmatmul.msk.f32.gmra.mxu2 %vm295_vm0, %v253_v51 }
  0x38   : > { %3016 = vmatmul.msk.f32.gmra.mxu0 %vm295_vm0, %v222_v18  ;;  %3032 = vmatmul.msk.f32.gmra.mxu1 %vm295_vm0, %v238_v19 }
  0x3a   : > { %3048 = vmatmul.msk.f32.gmra.mxu2 %vm295_vm0, %v254_v57  ;;  %v3141_v57 = vld [vmem:[%s5552_s1 + $0x40] sm:$0xff] }
  0x40   : > { %3017 = vmatmul.msk.f32.gmra.mxu0 %vm295_vm0, %v223_v20  ;;  %3033 = vmatmul.msk.f32.gmra.mxu1 %vm295_vm0, %v239_v21  ;;  %v259_v20 = vld [vmem:[%s3924_s21 + $0x140] sm:$0xff]  ;;  %v3144_v21 = vld [vmem:[%s5552_s1 + $0x58] sm:$0xff] }
  0x41   : > { %1452 = vmatpush.msrb.mxu2 %v3144_v21  ;;  %v3221_v21 = vld [vmem:[%s5554_s3 + $0x78] sm:$0xff] }
  0x42   : > { %3049 = vmatmul.msk.f32.gmra.mxu2 %vm295_vm0, %v255_v62  ;;  %1922 = vmatpush.msrb.mxu3 %v3221_v21  ;;  %v274_v21 = vld [vmem:[%s3924_s21 + $0x1b8] sm:$0xff] }
  0x43   : > { %1453 = vmatpush.msrb.mxu2 %v3143_v32 }
  0x48   : > { %3018 = vmatmul.msk.f32.gmra.mxu0 %vm295_vm0, %v224_v23  ;;  %3034 = vmatmul.msk.f32.gmra.mxu1 %vm295_vm0, %v240_v24 }
  0x4a   : > { %3050 = vmatmul.msk.f32.gmra.mxu2 %vm295_vm0, %v256_v4 }
  0x50   : > { %3019 = vmatmul.msk.f32.gmra.mxu0 %vm295_vm0, %v225_v25  ;;  %3035 = vmatmul.msk.f32.gmra.mxu1 %vm295_vm0, %v241_v26  ;;  %v260_v26 = vld [vmem:[%s3924_s21 + $0x148] sm:$0xff] }
  0x52   : > { %3051 = vmatmul.msk.f32.gmra.mxu2 %vm295_vm0, %v257_v9 }
  0x58   : > { %3020 = vmatmul.msk.f32.gmra.mxu0 %vm295_vm0, %v226_v28  ;;  %3036 = vmatmul.msk.f32.gmra.mxu1 %vm295_vm0, %v242_v29 }
  0x5a   : > { %3052 = vmatmul.msk.f32.gmra.mxu2 %vm295_vm0, %v258_v15  ;;  %v267_v15 = vld [vmem:[%s3924_s21 + $0x180] sm:$0xff] }
  0x5b   : > { %3061 = vmatmul.msk.f32.vlgmr.msra.gmra.mxu3 %vm295_vm0, %v267_v15 }
  0x60   : > { %3021 = vmatmul.msk.f32.gmra.mxu0 %vm295_vm0, %v227_v30  ;;  %3037 = vmatmul.msk.f32.gmra.mxu1 %vm295_vm0, %v243_v31  ;;  %v261_v31 = vld [vmem:[%s3924_s21 + $0x150] sm:$0xff] }
  0x62   : > { %3053 = vmatmul.msk.f32.gmra.mxu2 %vm295_vm0, %v259_v20 }
  0x68   : > { %3022 = vmatmul.msk.f32.gmra.mxu0 %vm295_vm0, %v228_v33  ;;  %3038 = vmatmul.msk.f32.gmra.mxu1 %vm295_vm0, %v244_v34 }
  0x6a   : > { %3054 = vmatmul.msk.f32.gmra.mxu2 %vm295_vm0, %v260_v26  ;;  %v268_v26 = vld [vmem:[%s3924_s21 + $0x188] sm:$0xff] }
  0x6b   : > { %3062 = vmatmul.msk.f32.gmra.mxu3 %vm295_vm0, %v268_v26 }
  0x70   : > { %3023 = vmatmul.msk.f32.gmra.mxu0 %vm295_vm0, %v229_v35  ;;  %3039 = vmatmul.msk.f32.gmra.mxu1 %vm295_vm0, %v245_v36 }
  0x72   : > { %3055 = vmatmul.msk.f32.gmra.mxu2 %vm295_vm0, %v261_v31 }
  0x78   : > { %3024 = vmatmul.msk.f32.gmra.mxu0 %vm295_vm0, %v230_v38  ;;  %3040 = vmatmul.msk.f32.gmra.mxu1 %vm295_vm0, %v246_v39 }
  0x7a   : > { %3056 = vmatmul.msk.f32.gmra.mxu2 %vm295_vm0, %v262_v37 }
  0x80   : > { %3025 = vmatmul.msk.f32.gmra.mxu0 %vm295_vm0, %v231_v40  ;;  %3041 = vmatmul.msk.f32.gmra.mxu1 %vm295_vm0, %v247_v41 }
  0x88   : > { %3026 = vmatmul.msk.f32.gmra.mxu0 %vm295_vm0, %v232_v42  ;;  %3042 = vmatmul.msk.f32.gmra.mxu1 %vm295_vm0, %v248_v43  ;;  %v263_v42 = vld [vmem:[%s3924_s21 + $0x160] sm:$0xff]  ;;  %v3142_v43 = vld [vmem:[%s5552_s1 + $0x48] sm:$0xff] }
  0x89   : > { %3057 = vmatmul.msk.f32.gmra.mxu2 %vm295_vm0, %v263_v42  ;;  %v270_v42 = vld [vmem:[%s3924_s21 + $0x198] sm:$0xff] }
  0x8a   : > { %1454 = vmatpush.msrb.mxu2 %v3142_v43 }
  0x8c   : > { %1455 = vmatpush.msrb.mxu2 %v3141_v57 }
  0x90   : > { %3027 = vmatmul.msk.f32.gmra.mxu0 %vm295_vm0, %v233_v46  ;;  %3043 = vmatmul.msk.f32.gmra.mxu1 %vm295_vm0, %v249_v47 }
  0x91   : > { %3058 = vmatmul.msk.f32.gmra.mxu2 %vm295_vm0, %v264_v48  ;;  %v271_v48 = vld [vmem:[%s3924_s21 + $0x1a0] sm:$0xff] }
  0x98   : > { %3028 = vmatmul.msk.f32.gmra.mxu0 %vm295_vm0, %v234_v49  ;;  %3044 = vmatmul.msk.f32.gmra.mxu1 %vm295_vm0, %v250_v50 }
  0x9d   : > { %v505_v54 = vpop.f32.mrf.mxu0  ;;  %v4034_v55 = vpop.f32.mrf.mxu1 }
  0x9e   : > { %v4037_v56 = vadd.f32 %v4032_v53, %v505_v54  ;;  %v265_v54 = vld [vmem:[%s3924_s21 + $0x170] sm:$0xff] }
  0x9f   : > { %3059 = vmatmul.msk.f32.gmra.mxu2 %vm295_vm0, %v265_v54  ;;  %v3219_v54 = vld [vmem:[%s5554_s3 + $0x68] sm:$0xff] }
  0xa0   : > { %3494 = vtanh.f32 %v4037_v56 }
  0xa5   : > { %v508_v58 = vpop.f32.mrf.mxu0  ;;  %v4042_v59 = vpop.f32.mrf.mxu1 }
  0xa6   : > { %v3495_v60 = vpop.eup %3494  ;;  %v4045_v61 = vadd.f32 %v4032_v53, %v508_v58  ;;  %v266_v58 = vld [vmem:[%s3924_s21 + $0x178] sm:$0xff]  ;;  %v4175_v9 = vpop.f32.mrf.mxu2 }
  0xa7   : > { %3077 = vmatmul.msk.f32.vlgmr.msrb.gmra.mxu1 %vm295_vm0, %v3495_v60  ;;  %3060 = vmatmul.msk.f32.gmra.mxu2 %vm295_vm0, %v266_v58  ;;  %v272_v58 = vld [vmem:[%s3924_s21 + $0x1a8] sm:$0xff] }
  0xa8   : > { %3496 = vtanh.f32 %v4045_v61 }
  0xad   : > { %v511_v0 = vpop.f32.mrf.mxu0  ;;  %v4054_v1 = vpop.f32.mrf.mxu1 }
  0xae   : > { %v3497_v2 = vpop.eup %3496  ;;  %v4057_v3 = vadd.f32 %v4032_v53, %v511_v0 }
  0xaf   : > { %3078 = vmatmul.msk.f32.gmra.mxu1 %vm295_vm0, %v3497_v2 }
  0xb0   : > { %3498 = vtanh.f32 %v4057_v3 }
  0xb5   : > { %v514_v5 = vpop.f32.mrf.mxu0  ;;  %v4063_v6 = vpop.f32.mrf.mxu1 }
  0xb6   : > { %v3499_v7 = vpop.eup %3498  ;;  %v4066_v8 = vadd.f32 %v4032_v53, %v514_v5 }
  0xb7   : > { %3079 = vmatmul.msk.f32.gmra.mxu1 %vm295_vm0, %v3499_v7 }
  0xb8   : > { %3500 = vtanh.f32 %v4066_v8 }
  0xbd   : > { %v517_v11 = vpop.f32.mrf.mxu0  ;;  %v4075_v12 = vpop.f32.mrf.mxu1 }
  0xbe   : > { %v3501_v13 = vpop.eup %3500  ;;  %v4078_v14 = vadd.f32 %v4032_v53, %v517_v11 }
  0xbf   : > { %3080 = vmatmul.msk.f32.gmra.mxu1 %vm295_vm0, %v3501_v13 }
  0xc0   : > { %3502 = vtanh.f32 %v4078_v14 }
  0xc5   : > { %v520_v16 = vpop.f32.mrf.mxu0  ;;  %v4084_v17 = vpop.f32.mrf.mxu1 }
  0xc6   : > { %v3503_v18 = vpop.eup %3502  ;;  %v4087_v19 = vadd.f32 %v4032_v53, %v520_v16 }
  0xc7   : > { %3081 = vmatmul.msk.f32.gmra.mxu1 %vm295_vm0, %v3503_v18  ;;  %v4186_v18 = vpop.f32.mrf.mxu2 }
  0xc8   : > { %3504 = vtanh.f32 %v4087_v19 }
  0xcd   : > { %v523_v22 = vpop.f32.mrf.mxu0  ;;  %v4096_v23 = vpop.f32.mrf.mxu1 }
  0xce   : > { %v3505_v24 = vpop.eup %3504  ;;  %v4099_v25 = vadd.f32 %v4032_v53, %v523_v22 }
  0xcf   : > { %3082 = vmatmul.msk.f32.gmra.mxu1 %vm295_vm0, %v3505_v24  ;;  %v4204_v32 = vpop.f32.mrf.mxu2 }
  0xd0   : > { %3506 = vtanh.f32 %v4099_v25 }
  0xd5   : > { %v526_v27 = vpop.f32.mrf.mxu0  ;;  %v4105_v28 = vpop.f32.mrf.mxu1 }
  0xd6   : > { %v3507_v29 = vpop.eup %3506  ;;  %v4108_v30 = vadd.f32 %v4032_v53, %v526_v27 }
  0xd7   : > { %3083 = vmatmul.msk.f32.gmra.mxu1 %vm295_vm0, %v3507_v29  ;;  %v4202_v29 = vadd.f32 %v4032_v53, %v4034_v55  ;;  %v3220_v55 = vld [vmem:[%s5554_s3 + $0x70] sm:$0xff]  ;;  %v4222_v43 = vpop.f32.mrf.mxu2 }
  0xd8   : > { %3508 = vtanh.f32 %v4108_v30  ;;  %1923 = vmatpush.msrb.mxu3 %v3220_v55 }
  0xda   : > { %1924 = vmatpush.msrb.mxu3 %v3219_v54 }
  0xdd   : > { %v529_v33 = vpop.f32.mrf.mxu0  ;;  %v4117_v34 = vpop.f32.mrf.mxu1 }
  0xde   : > { %v3509_v35 = vpop.eup %3508  ;;  %v4120_v36 = vadd.f32 %v4032_v53, %v529_v33  ;;  %v269_v33 = vld [vmem:[%s3924_s21 + $0x190] sm:$0xff] }
  0xdf   : > { %3084 = vmatmul.msk.f32.gmra.mxu1 %vm295_vm0, %v3509_v35  ;;  %3063 = vmatmul.msk.f32.gmra.mxu3 %vm295_vm0, %v269_v33  ;;  %v4212_v35 = vadd.f32 %v4032_v53, %v4042_v59 }
  0xe0   : > { %3510 = vtanh.f32 %v4120_v36 }
  0xe5   : > { %v532_v38 = vpop.f32.mrf.mxu0  ;;  %v4126_v39 = vpop.f32.mrf.mxu1 }
  0xe6   : > { %v3511_v40 = vpop.eup %3510  ;;  %v4129_v41 = vadd.f32 %v4032_v53, %v532_v38 }
  0xe7   : > { %3085 = vmatmul.msk.f32.gmra.mxu1 %vm295_vm0, %v3511_v40  ;;  %3064 = vmatmul.msk.f32.gmra.mxu3 %vm295_vm0, %v270_v42 }
  0xe8   : > { %3512 = vtanh.f32 %v4129_v41 }
  0xed   : > { %v535_v44 = vpop.f32.mrf.mxu0  ;;  %v4138_v45 = vpop.f32.mrf.mxu1 }
  0xee   : > { %v3513_v46 = vpop.eup %3512  ;;  %v4141_v47 = vadd.f32 %v4032_v53, %v535_v44 }
  0xef   : > { %3086 = vmatmul.msk.f32.gmra.mxu1 %vm295_vm0, %v3513_v46  ;;  %3065 = vmatmul.msk.f32.gmra.mxu3 %vm295_vm0, %v271_v48  ;;  %v4316_v48 = vadd.f32 %v4032_v53, %v4126_v39  ;;  %v4331_v39 = vadd.f32 %v4032_v53, %v4138_v45 }
  0xf0   : > { %3514 = vtanh.f32 %v4141_v47 }
  0xf5   : > { %v538_v49 = vpop.f32.mrf.mxu0  ;;  %v4147_v50 = vpop.f32.mrf.mxu1 }
  0xf6   : > { %v3515_v51 = vpop.eup %3514  ;;  %v4150_v52 = vadd.f32 %v4032_v53, %v538_v49  ;;  %v4235_v49 = vpop.f32.mrf.mxu2  ;;  %v4343_v45 = vadd.f32 %v4032_v53, %v4147_v50 }
  0xf7   : > { %3087 = vmatmul.msk.f32.gmra.mxu1 %vm295_vm0, %v3515_v51  ;;  %3066 = vmatmul.msk.f32.gmra.mxu3 %vm295_vm0, %v272_v58 }
  0xf8   : > { %3516 = vtanh.f32 %v4150_v52 }
  0xfd   : > { %v541_v60 = vpop.f32.mrf.mxu0  ;;  %v4160_v62 = vpop.f32.mrf.mxu1 }
  0xfe   : > { %v3517_v63 = vpop.eup %3516  ;;  %v4163_v0 = vadd.f32 %v4032_v53, %v541_v60  ;;  %v4254_v60 = vpop.f32.mrf.mxu2 }
  0xff   : > { %3088 = vmatmul.msk.f32.gmra.mxu1 %vm295_vm0, %v3517_v63 }
 0x100   : > { %3518 = vtanh.f32 %v4163_v0 }
 0x105   : > { %v544_v2 = vpop.f32.mrf.mxu0  ;;  %v4171_v7 = vpop.f32.mrf.mxu1 }
 0x106   : > { %v3519_v4 = vpop.eup %3518  ;;  %v4169_v5 = vadd.f32 %v4032_v53, %v544_v2 }
 0x107   : > { %3089 = vmatmul.msk.f32.gmra.mxu1 %vm295_vm0, %v3519_v4  ;;  %v273_v4 = vld [vmem:[%s3924_s21 + $0x1b0] sm:$0xff] }
 0x108   : > { %3520 = vtanh.f32 %v4169_v5  ;;  %3067 = vmatmul.msk.f32.gmra.mxu3 %vm295_vm0, %v273_v4 }
 0x10d   : > { %v547_v10 = vpop.f32.mrf.mxu0  ;;  %v4183_v16 = vpop.f32.mrf.mxu1 }
 0x10e   : > { %v3521_v11 = vpop.eup %3520  ;;  %v4178_v13 = vadd.f32 %v4032_v53, %v547_v10 }
 0x10f   : > { %3090 = vmatmul.msk.f32.gmra.mxu1 %vm295_vm0, %v3521_v11 }
 0x110   : > { %3522 = vtanh.f32 %v4178_v13  ;;  %3068 = vmatmul.msk.f32.gmra.mxu3 %vm295_vm0, %v274_v21 }
 0x115   : > { %v550_v20 = vpop.f32.mrf.mxu0  ;;  %v4198_v27 = vpop.f32.mrf.mxu1 }
 0x116   : > { %v3523_v22 = vpop.eup %3522  ;;  %v4192_v24 = vadd.f32 %v4032_v53, %v550_v20  ;;  %v4270_v20 = vpop.f32.mrf.mxu2 }
 0x117   : > { %3091 = vmatmul.msk.f32.gmra.mxu1 %vm295_vm0, %v3523_v22 }
 0x118   : > { %3524 = vtanh.f32 %v4192_v24 }
 0x119   : > { %3526 = vtanh.f32 %v4202_v29 }
 0x11a   : > { %3528 = vtanh.f32 %v4212_v35 }
 0x11e   : > { %v3525_v31 = vpop.eup %3524  ;;  %v4286_v33 = vpop.f32.mrf.mxu2 }
 0x11f   : > { %3092 = vmatmul.msk.f32.gmra.mxu1 %vm295_vm0, %v3525_v31  ;;  %v3527_v40 = vpop.eup %3526  ;;  %v275_v31 = vld [vmem:[%s3924_s21 + $0x1c0] sm:$0xff] }
 0x120   : > { %v3529_v46 = vpop.eup %3528  ;;  %3069 = vmatmul.msk.f32.gmra.mxu3 %vm295_vm0, %v275_v31 }
 0x124   : > { %v978_v37 = vpop.f32.mrf.mxu1 }
 0x125   : > { %v1170_v38 = vadd.f32 %v978_v37, %v4037_v56  ;;  %v4227_v56 = vadd.f32 %v4032_v53, %v4054_v1  ;;  %v4239_v1 = vadd.f32 %v4032_v53, %v4063_v6  ;;  %v4252_v6 = vadd.f32 %v4032_v53, %v4075_v12 }
 0x126   : > { %v4264_v12 = vadd.f32 %v4032_v53, %v4084_v17 }
 0x127   : > { %3093 = vmatmul.msk.f32.gmra.mxu1 %vm295_vm0, %v3527_v40  ;;  %3150 = vmatmul.msk.f32.vlgmr.msrb.gmra.mxu2 %vm295_vm0, %v1170_v38  ;;  %3530 = vtanh.f32 %v4227_v56  ;;  %v3217_v38 = vld [vmem:[%s5554_s3 + $0x58] sm:$0xff]  ;;  %v276_v40 = vld [vmem:[%s3924_s21 + $0x1c8] sm:$0xff] }
 0x128   : > { %3532 = vtanh.f32 %v4239_v1  ;;  %3070 = vmatmul.msk.f32.gmra.mxu3 %vm295_vm0, %v276_v40 }
 0x129   : > { %3534 = vtanh.f32 %v4252_v6 }
 0x12a   : > { %3536 = vtanh.f32 %v4264_v12 }
 0x12c   : > { %v981_v59 = vpop.f32.mrf.mxu1 }
 0x12d   : > { %v1171_v44 = vadd.f32 %v981_v59, %v4045_v61  ;;  %v3531_v57 = vpop.eup %3530 }
 0x12e   : > { %v3533_v2 = vpop.eup %3532 }
 0x12f   : > { %3094 = vmatmul.msk.f32.gmra.mxu1 %vm295_vm0, %v3529_v46  ;;  %3151 = vmatmul.msk.f32.gmra.mxu2 %vm295_vm0, %v1171_v44  ;;  %v3535_v15 = vpop.eup %3534  ;;  %v277_v46 = vld [vmem:[%s3924_s21 + $0x1d0] sm:$0xff] }
 0x130   : > { %v3537_v26 = vpop.eup %3536  ;;  %3071 = vmatmul.msk.f32.gmra.mxu3 %vm295_vm0, %v277_v46 }
 0x134   : > { %v984_v51 = vpop.f32.mrf.mxu1 }
 0x135   : > { %v1172_v61 = vadd.f32 %v984_v51, %v4057_v3 }
 0x137   : > { %3095 = vmatmul.msk.f32.gmra.mxu1 %vm295_vm0, %v3531_v57  ;;  %3152 = vmatmul.msk.f32.gmra.mxu2 %vm295_vm0, %v1172_v61  ;;  %v3216_v61 = vld [vmem:[%s5554_s3 + $0x50] sm:$0xff]  ;;  %v278_v57 = vld [vmem:[%s3924_s21 + $0x1d8] sm:$0xff] }
 0x138   : > { %3072 = vmatmul.msk.f32.gmra.mxu3 %vm295_vm0, %v278_v57 }
 0x13c   : > { %v987_v3 = vpop.f32.mrf.mxu1 }
 0x13d   : > { %v1173_v63 = vadd.f32 %v987_v3, %v4066_v8  ;;  %v3218_v8 = vld [vmem:[%s5554_s3 + $0x60] sm:$0xff] }
 0x13e   : > { %1925 = vmatpush.msrb.mxu3 %v3218_v8  ;;  %v280_v8 = vld [vmem:[%s3924_s21 + $0x1e8] sm:$0xff] }
 0x13f   : > { %3096 = vmatmul.msk.f32.gmra.mxu1 %vm295_vm0, %v3533_v2  ;;  %3153 = vmatmul.msk.f32.gmra.mxu2 %vm295_vm0, %v1173_v63  ;;  %v279_v2 = vld [vmem:[%s3924_s21 + $0x1e0] sm:$0xff] }
 0x140   : > { %1926 = vmatpush.msrb.mxu3 %v3217_v38  ;;  %v282_v38 = vld [vmem:[%s3924_s21 + $0x1f8] sm:$0xff] }
 0x141   : > { %3073 = vmatmul.msk.f32.gmra.mxu3 %vm295_vm0, %v279_v2  ;;  %v4428_v2 = vld [vmem:[%s5553_s2 + $0x1] ss:$0 sm:$0xff] }
 0x142   : > { %1927 = vmatpush.msrb.mxu3 %v3216_v61 }
 0x144   : > { %v990_v10 = vpop.f32.mrf.mxu1 }
 0x145   : > { %v1174_v11 = vadd.f32 %v990_v10, %v4078_v14  ;;  %v4279_v14 = vadd.f32 %v4032_v53, %v4096_v23  ;;  %v4291_v23 = vadd.f32 %v4032_v53, %v4105_v28  ;;  %v4302_v28 = vpop.f32.mrf.mxu2  ;;  %v3215_v10 = vld [vmem:[%s5554_s3 + $0x48] sm:$0xff] }
 0x146   : > { %1928 = vmatpush.msrb.mxu3 %v3215_v10 }
 0x147   : > { %3097 = vmatmul.msk.f32.gmra.mxu1 %vm295_vm0, %v3535_v15  ;;  %3154 = vmatmul.msk.f32.gmra.mxu2 %vm295_vm0, %v1174_v11  ;;  %3538 = vtanh.f32 %v4279_v14 }
 0x148   : > { %3540 = vtanh.f32 %v4291_v23 }
 0x149   : > { %3074 = vmatmul.msk.f32.gmra.mxu3 %vm295_vm0, %v280_v8  ;;  %v3292_v8 = vld [vmem:[%s5552_s1 + $0xb0] sm:$0xff] }
 0x14c   : > { %v993_v17 = vpop.f32.mrf.mxu1 }
 0x14d   : > { %v1175_v22 = vadd.f32 %v993_v17, %v4087_v19  ;;  %v3539_v55 = vpop.eup %3538  ;;  %v4318_v51 = vpop.f32.mrf.mxu2 }
 0x14e   : > { %v3541_v44 = vpop.eup %3540 }
 0x14f   : > { %3098 = vmatmul.msk.f32.gmra.mxu1 %vm295_vm0, %v3537_v26  ;;  %3155 = vmatmul.msk.f32.gmra.mxu2 %vm295_vm0, %v1175_v22  ;;  %v281_v22 = vld [vmem:[%s3924_s21 + $0x1f0] sm:$0xff] }
 0x151   : > { %3075 = vmatmul.msk.f32.gmra.mxu3 %vm295_vm0, %v281_v22 }
 0x154   : > { %v996_v37 = vpop.f32.mrf.mxu1 }
 0x155   : > { %v1176_v19 = vadd.f32 %v996_v37, %v4099_v25  ;;  %v4306_v25 = vadd.f32 %v4032_v53, %v4117_v34  ;;  %v4334_v63 = vpop.f32.mrf.mxu2  ;;  %v3214_v37 = vld [vmem:[%s5554_s3 + $0x40] sm:$0xff] }
 0x156   : > { %1929 = vmatpush.msrb.mxu3 %v3214_v37 }
 0x157   : > { %3099 = vmatmul.msk.f32.gmra.mxu1 %vm295_vm0, %v3539_v55  ;;  %3156 = vmatmul.msk.f32.gmra.mxu2 %vm295_vm0, %v1176_v19  ;;  %3542 = vtanh.f32 %v4306_v25 }
 0x158   : > { %3544 = vtanh.f32 %v4316_v48 }
 0x159   : > { %3546 = vtanh.f32 %v4331_v39  ;;  %3076 = vmatmul.msk.f32.gmra.mxu3 %vm295_vm0, %v282_v38 }
 0x15a   : > { %3548 = vtanh.f32 %v4343_v45 }
 0x15c   : > { %v999_v42 = vpop.f32.mrf.mxu1 }
 0x15d   : > { %v1177_v59 = vadd.f32 %v999_v42, %v4108_v30  ;;  %v3543_v54 = vpop.eup %3542  ;;  %v4353_v15 = vpop.f32.mrf.mxu2 }
 0x15e   : > { %v3545_v3 = vpop.eup %3544 }
 0x15f   : > { %3100 = vmatmul.msk.f32.gmra.mxu1 %vm295_vm0, %v3541_v44  ;;  %3157 = vmatmul.msk.f32.gmra.mxu2 %vm295_vm0, %v1177_v59  ;;  %v3547_v11 = vpop.eup %3546  ;;  %v4393_v59 = vadd.f32 %v4032_v53, %v4198_v27 }
 0x160   : > { %v3549_v17 = vpop.eup %3548 }
 0x164   : > { %v1002_v34 = vpop.f32.mrf.mxu1 }
 0x165   : > { %v1178_v30 = vadd.f32 %v1002_v34, %v4120_v36  ;;  %v4366_v26 = vpop.f32.mrf.mxu2 }
 0x167   : > { %3101 = vmatmul.msk.f32.gmra.mxu1 %vm295_vm0, %v3543_v54  ;;  %3158 = vmatmul.msk.f32.gmra.mxu2 %vm295_vm0, %v1178_v30  ;;  %v4405_v30 = vadd.f32 %v4032_v53, %v4175_v9  ;;  %v4420_v9 = vadd.f32 %v4032_v53, %v4186_v18 }
 0x16c   : > { %v1005_v36 = vpop.f32.mrf.mxu1 }
 0x16d   : > { %v1179_v58 = vadd.f32 %v1005_v36, %v4129_v41  ;;  %v4384_v40 = vpop.f32.mrf.mxu2 }
 0x16f   : > { %3102 = vmatmul.msk.f32.gmra.mxu1 %vm295_vm0, %v3545_v3  ;;  %3159 = vmatmul.msk.f32.gmra.mxu2 %vm295_vm0, %v1179_v58 }
 0x174   : > { %v1008_v4 = vpop.f32.mrf.mxu1 }
 0x175   : > { %v1180_v41 = vadd.f32 %v1008_v4, %v4141_v47  ;;  %v4358_v47 = vadd.f32 %v4032_v53, %v4160_v62  ;;  %v4370_v62 = vadd.f32 %v4032_v53, %v4171_v7  ;;  %v4382_v7 = vadd.f32 %v4032_v53, %v4183_v16  ;;  %v4396_v34 = vpop.f32.mrf.mxu2 }
 0x177   : > { %3103 = vmatmul.msk.f32.gmra.mxu1 %vm295_vm0, %v3547_v11  ;;  %3160 = vmatmul.msk.f32.gmra.mxu2 %vm295_vm0, %v1180_v41  ;;  %3550 = vtanh.f32 %v4358_v47 }
 0x178   : > { %3552 = vtanh.f32 %v4370_v62 }
 0x179   : > { %3554 = vtanh.f32 %v4382_v7 }
 0x17a   : > { %3556 = vtanh.f32 %v4393_v59 }
 0x17b   : > { %3558 = vtanh.f32 %v4405_v30 }
 0x17c   : > { %v1011_v50 = vpop.f32.mrf.mxu1  ;;  %3560 = vtanh.f32 %v4420_v9 }
 0x17d   : > { %v1181_v21 = vadd.f32 %v1011_v50, %v4150_v52  ;;  %v3551_v19 = vpop.eup %3550  ;;  %v4414_v57 = vpop.f32.mrf.mxu2 }
 0x17e   : > { %v3553_v42 = vpop.eup %3552 }
 0x17f   : > { %3104 = vmatmul.msk.f32.gmra.mxu1 %vm295_vm0, %v3549_v17  ;;  %3161 = vmatmul.msk.f32.gmra.mxu2 %vm295_vm0, %v1181_v21  ;;  %v3555_v46 = vpop.eup %3554 }
 0x180   : > { %v3557_v54 = vpop.eup %3556 }
 0x181   : > { %v3559_v3 = vpop.eup %3558 }
 0x182   : > { %v3561_v50 = vpop.eup %3560 }
 0x184   : > { %v1014_v31 = vpop.f32.mrf.mxu1 }
 0x185   : > { %v1182_v52 = vadd.f32 %v1014_v31, %v4163_v0 }
 0x187   : > { %3105 = vmatmul.msk.f32.gmra.mxu1 %vm295_vm0, %v3551_v19  ;;  %3162 = vmatmul.msk.f32.gmra.mxu2 %vm295_vm0, %v1182_v52 }
 0x18c   : > { %v1017_v55 = vpop.f32.mrf.mxu1 }
 0x18d   : > { %v1183_v0 = vadd.f32 %v1017_v55, %v4169_v5  ;;  %v4400_v5 = vpop.f32.mrf.mxu3  ;;  %v4468_v55 = vadd.f32 %v4032_v53, %v4235_v49 }
 0x18f   : > { %3106 = vmatmul.msk.f32.gmra.mxu1 %vm295_vm0, %v3553_v42  ;;  %3163 = vmatmul.msk.f32.gmra.mxu2 %vm295_vm0, %v1183_v0  ;;  %v3291_v42 = vld [vmem:[%s5552_s1 + $0xa8] sm:$0xff] }
 0x194   : > { %v1020_v16 = vpop.f32.mrf.mxu1 }
 0x195   : > { %v1184_v44 = vadd.f32 %v1020_v16, %v4178_v13  ;;  %v3293_v13 = vld [vmem:[%s5552_s1 + $0xb8] sm:$0xff]  ;;  %v4416_v36 = vpop.f32.mrf.mxu3 }
 0x196   : > { %2401 = vmatpush.msrb.mxu0 %v3293_v13 }
 0x197   : > { %3107 = vmatmul.msk.f32.gmra.mxu1 %vm295_vm0, %v3555_v46  ;;  %3164 = vmatmul.msk.f32.gmra.mxu2 %vm295_vm0, %v1184_v44 }
 0x198   : > { %2402 = vmatpush.msrb.mxu0 %v3292_v8 }
 0x19a   : > { %2403 = vmatpush.msrb.mxu0 %v3291_v42 }
 0x19c   : > { %v1023_v27 = vpop.f32.mrf.mxu1 }
 0x19d   : > { %v1185_v61 = vadd.f32 %v1023_v27, %v4192_v24  ;;  %v4434_v18 = vpop.f32.mrf.mxu3 }
 0x19f   : > { %3108 = vmatmul.msk.f32.gmra.mxu1 %vm295_vm0, %v3557_v54  ;;  %3165 = vmatmul.msk.f32.gmra.mxu2 %vm295_vm0, %v1185_v61 }
 0x1a4   : > { %v1026_v24 = vpop.f32.mrf.mxu1 }
 0x1a5   : > { %v1186_v58 = vadd.f32 %v1026_v24, %v4202_v29  ;;  %v4438_v29 = vadd.f32 %v4032_v53, %v4204_v32  ;;  %v4458_v52 = vpop.f32.mrf.mxu3 }
 0x1a7   : > { %3109 = vmatmul.msk.f32.gmra.mxu1 %vm295_vm0, %v3559_v3  ;;  %3166 = vmatmul.msk.f32.gmra.mxu2 %vm295_vm0, %v1186_v58 }
 0x1aa   : > { %v1457_v4 = vpop.f32.mrf.mxu2 }
 0x1ab   : > { %v4432_v41 = vadd.f32 %v4428_v2, %v1457_v4  ;;  %v4501_v4 = vadd.f32 %v4032_v53, %v4270_v20 }
 0x1ac   : > { %v1029_v10 = vpop.f32.mrf.mxu1 }
 0x1ad   : > { %3562 = vtanh.f32 %v4432_v41  ;;  %v1187_v11 = vadd.f32 %v1029_v10, %v4212_v35  ;;  %v4453_v35 = vadd.f32 %v4032_v53, %v4222_v43  ;;  %v4478_v44 = vpop.f32.mrf.mxu3 }
 0x1ae   : > { %3564 = vtanh.f32 %v4438_v29 }
 0x1af   : > { %3110 = vmatmul.msk.f32.gmra.mxu1 %vm295_vm0, %v3561_v50  ;;  %3167 = vmatmul.msk.f32.gmra.mxu2 %vm295_vm0, %v1187_v11  ;;  %v3290_v11 = vld [vmem:[%s5552_s1 + $0xa0] sm:$0xff] }
 0x1b0   : > { %2404 = vmatpush.msrb.mxu0 %v3290_v11  ;;  %v4565_v11 = vadd.f32 %v4032_v53, %v4334_v63 }
 0x1b2   : > { %v1460_v21 = vpop.f32.mrf.mxu2 }
 0x1b3   : > { %v3563_v32 = vpop.eup %3562  ;;  %v4449_v17 = vadd.f32 %v4428_v2, %v1460_v21 }
 0x1b4   : > { %v1032_v22 = vpop.f32.mrf.mxu1  ;;  %3222 = vmatmul.msk.f32.vlgmr.msrb.gmra.mxu3 %vm295_vm0, %v3563_v32  ;;  %v3565_v37 = vpop.eup %3564 }
 0x1b5   : > { %3566 = vtanh.f32 %v4449_v17  ;;  %v1188_v31 = vadd.f32 %v1032_v22, %v4227_v56  ;;  %v4494_v24 = vpop.f32.mrf.mxu3 }
 0x1b6   : > { %3568 = vtanh.f32 %v4453_v35 }
 0x1b7   : > { %3111 = vmatmul.msk.f32.gmra.mxu1 %vm295_vm0, %v3565_v37  ;;  %3168 = vmatmul.msk.f32.gmra.mxu2 %vm295_vm0, %v1188_v31 }
 0x1ba   : > { %v1463_v19 = vpop.f32.mrf.mxu2 }
 0x1bb   : > { %v3567_v38 = vpop.eup %3566  ;;  %v4464_v43 = vadd.f32 %v4428_v2, %v1463_v19 }
 0x1bc   : > { %v1035_v0 = vpop.f32.mrf.mxu1  ;;  %3223 = vmatmul.msk.f32.gmra.mxu3 %vm295_vm0, %v3567_v38  ;;  %v3569_v16 = vpop.eup %3568 }
 0x1bd   : > { %3570 = vtanh.f32 %v4464_v43  ;;  %v1189_v56 = vadd.f32 %v1035_v0, %v4239_v1  ;;  %v4486_v1 = vadd.f32 %v4032_v53, %v4254_v60  ;;  %v4515_v32 = vpop.f32.mrf.mxu3 }
 0x1be   : > { %3572 = vtanh.f32 %v4468_v55 }
 0x1bf   : > { %3112 = vmatmul.msk.f32.gmra.mxu1 %vm295_vm0, %v3569_v16  ;;  %3169 = vmatmul.msk.f32.gmra.mxu2 %vm295_vm0, %v1189_v56  ;;  %v3289_v16 = vld [vmem:[%s5552_s1 + $0x98] sm:$0xff] }
 0x1c0   : > { %2405 = vmatpush.msrb.mxu0 %v3289_v16 }
 0x1c2   : > { %v1466_v49 = vpop.f32.mrf.mxu2 }
 0x1c3   : > { %v3571_v46 = vpop.eup %3570  ;;  %v4482_v27 = vadd.f32 %v4428_v2, %v1466_v49 }
 0x1c4   : > { %v1038_v61 = vpop.f32.mrf.mxu1  ;;  %3224 = vmatmul.msk.f32.gmra.mxu3 %vm295_vm0, %v3571_v46  ;;  %v3573_v54 = vpop.eup %3572 }
 0x1c5   : > { %3574 = vtanh.f32 %v4482_v27  ;;  %v1190_v13 = vadd.f32 %v1038_v61, %v4252_v6  ;;  %v4537_v42 = vpop.f32.mrf.mxu3 }
 0x1c6   : > { %3576 = vtanh.f32 %v4486_v1 }
 0x1c7   : > { %3113 = vmatmul.msk.f32.gmra.mxu1 %vm295_vm0, %v3573_v54  ;;  %3170 = vmatmul.msk.f32.gmra.mxu2 %vm295_vm0, %v1190_v13 }
 0x1ca   : > { %v1469_v58 = vpop.f32.mrf.mxu2 }
 0x1cb   : > { %v3575_v3 = vpop.eup %3574  ;;  %v4497_v60 = vadd.f32 %v4428_v2, %v1469_v58 }
 0x1cc   : > { %v1041_v10 = vpop.f32.mrf.mxu1  ;;  %3225 = vmatmul.msk.f32.gmra.mxu3 %vm295_vm0, %v3575_v3  ;;  %v3577_v8 = vpop.eup %3576 }
 0x1cd   : > { %3578 = vtanh.f32 %v4497_v60  ;;  %v1191_v6 = vadd.f32 %v1041_v10, %v4264_v12  ;;  %v4519_v12 = vadd.f32 %v4032_v53, %v4286_v33  ;;  %v4532_v33 = vadd.f32 %v4032_v53, %v4302_v28  ;;  %v4557_v3 = vpop.f32.mrf.mxu3 }
 0x1ce   : > { %3580 = vtanh.f32 %v4501_v4 }
 0x1cf   : > { %3114 = vmatmul.msk.f32.gmra.mxu1 %vm295_vm0, %v3577_v8  ;;  %3171 = vmatmul.msk.f32.gmra.mxu2 %vm295_vm0, %v1191_v6 }
 0x1d2   : > { %v1472_v20 = vpop.f32.mrf.mxu2 }
 0x1d3   : > { %v3579_v50 = vpop.eup %3578  ;;  %v4513_v21 = vadd.f32 %v4428_v2, %v1472_v20  ;;  %v3288_v20 = vld [vmem:[%s5552_s1 + $0x90] sm:$0xff] }
 0x1d4   : > { %v1044_v22 = vpop.f32.mrf.mxu1  ;;  %3226 = vmatmul.msk.f32.gmra.mxu3 %vm295_vm0, %v3579_v50  ;;  %v3581_v37 = vpop.eup %3580  ;;  %2406 = vmatpush.msrb.mxu0 %v3288_v20 }
 0x1d5   : > { %3582 = vtanh.f32 %v4513_v21  ;;  %v1192_v31 = vadd.f32 %v1044_v22, %v4279_v14  ;;  %v4576_v63 = vpop.f32.mrf.mxu3 }
 0x1d6   : > { %3584 = vtanh.f32 %v4519_v12 }
 0x1d7   : > { %3115 = vmatmul.msk.f32.gmra.mxu1 %vm295_vm0, %v3581_v37  ;;  %3172 = vmatmul.msk.f32.gmra.mxu2 %vm295_vm0, %v1192_v31 }
 0x1da   : > { %v1475_v19 = vpop.f32.mrf.mxu2 }
 0x1db   : > { %v3583_v38 = vpop.eup %3582  ;;  %v4528_v0 = vadd.f32 %v4428_v2, %v1475_v19 }
 0x1dc   : > { %v1047_v56 = vpop.f32.mrf.mxu1  ;;  %3227 = vmatmul.msk.f32.gmra.mxu3 %vm295_vm0, %v3583_v38  ;;  %v3585_v49 = vpop.eup %3584 }
 0x1dd   : > { %3586 = vtanh.f32 %v4528_v0  ;;  %v1193_v14 = vadd.f32 %v1047_v56, %v4291_v23  ;;  %v4550_v23 = vadd.f32 %v4032_v53, %v4318_v51 }
 0x1de   : > { %3588 = vtanh.f32 %v4532_v33 }
 0x1df   : > { %3116 = vmatmul.msk.f32.gmra.mxu1 %vm295_vm0, %v3585_v49  ;;  %3173 = vmatmul.msk.f32.gmra.mxu2 %vm295_vm0, %v1193_v14 }
 0x1e2   : > { %v1478_v28 = vpop.f32.mrf.mxu2 }
 0x1e3   : > { %v3587_v46 = vpop.eup %3586  ;;  %v4546_v61 = vadd.f32 %v4428_v2, %v1478_v28  ;;  %v4598_v28 = vadd.f32 %v4032_v53, %v4366_v26 }
 0x1e4   : > { %v1050_v13 = vpop.f32.mrf.mxu1  ;;  %3228 = vmatmul.msk.f32.gmra.mxu3 %vm295_vm0, %v3587_v46  ;;  %v3589_v58 = vpop.eup %3588 }
 0x1e5   : > { %3590 = vtanh.f32 %v4546_v61  ;;  %v1194_v54 = vadd.f32 %v1050_v13, %v4306_v25  ;;  %v3287_v13 = vld [vmem:[%s5552_s1 + $0x88] sm:$0xff] }
 0x1e6   : > { %3592 = vtanh.f32 %v4550_v23  ;;  %2407 = vmatpush.msrb.mxu0 %v3287_v13 }
 0x1e7   : > { %3117 = vmatmul.msk.f32.gmra.mxu1 %vm295_vm0, %v3589_v58  ;;  %3174 = vmatmul.msk.f32.gmra.mxu2 %vm295_vm0, %v1194_v54 }
 0x1ea   : > { %v1481_v10 = vpop.f32.mrf.mxu2 }
 0x1eb   : > { %v3591_v6 = vpop.eup %3590  ;;  %v4561_v51 = vadd.f32 %v4428_v2, %v1481_v10 }
 0x1ec   : > { %v1053_v8 = vpop.f32.mrf.mxu1  ;;  %3229 = vmatmul.msk.f32.gmra.mxu3 %vm295_vm0, %v3591_v6  ;;  %v3593_v50 = vpop.eup %3592 }
 0x1ed   : > { %3594 = vtanh.f32 %v4561_v51  ;;  %v1195_v25 = vadd.f32 %v1053_v8, %v4316_v48  ;;  %v4583_v48 = vadd.f32 %v4032_v53, %v4353_v15  ;;  %v4594_v15 = vpop.f32.mrf.mxu3 }
 0x1ee   : > { %3596 = vtanh.f32 %v4565_v11 }
 0x1ef   : > { %3118 = vmatmul.msk.f32.gmra.mxu1 %vm295_vm0, %v3593_v50  ;;  %3175 = vmatmul.msk.f32.gmra.mxu2 %vm295_vm0, %v1195_v25 }
 0x1f2   : > { %v1484_v22 = vpop.f32.mrf.mxu2 }
 0x1f3   : > { %v3595_v31 = vpop.eup %3594  ;;  %v4579_v37 = vadd.f32 %v4428_v2, %v1484_v22 }
 0x1f4   : > { %v1056_v19 = vpop.f32.mrf.mxu1  ;;  %3230 = vmatmul.msk.f32.gmra.mxu3 %vm295_vm0, %v3595_v31  ;;  %v3597_v56 = vpop.eup %3596  ;;  %v4629_v31 = vadd.f32 %v4032_v53, %v4396_v34 }
 0x1f5   : > { %3598 = vtanh.f32 %v4579_v37  ;;  %v1196_v38 = vadd.f32 %v1056_v19, %v4331_v39  ;;  %v4619_v25 = vpop.f32.mrf.mxu3 }
 0x1f6   : > { %3600 = vtanh.f32 %v4583_v48 }
 0x1f7   : > { %3119 = vmatmul.msk.f32.gmra.mxu1 %vm295_vm0, %v3597_v56  ;;  %3176 = vmatmul.msk.f32.gmra.mxu2 %vm295_vm0, %v1196_v38  ;;  %v3286_v38 = vld [vmem:[%s5552_s1 + $0x80] sm:$0xff] }
 0x1f8   : > { %2408 = vmatpush.msrb.mxu0 %v3286_v38 }
 0x1fa   : > { %v1487_v14 = vpop.f32.mrf.mxu2 }
 0x1fb   : > { %v3599_v16 = vpop.eup %3598  ;;  %v4592_v49 = vadd.f32 %v4428_v2, %v1487_v14 }
 0x1fc   : > { %v1059_v46 = vpop.f32.mrf.mxu1  ;;  %3231 = vmatmul.msk.f32.gmra.mxu3 %vm295_vm0, %v3599_v16  ;;  %v3601_v54 = vpop.eup %3600 }
 0x1fd   : > { %3602 = vtanh.f32 %v4592_v49  ;;  %v1197_v39 = vadd.f32 %v1059_v46, %v4343_v45  ;;  %v4614_v45 = vadd.f32 %v4032_v53, %v4384_v40  ;;  %v4639_v14 = vpop.f32.mrf.mxu3 }
 0x1fe   : > { %3604 = vtanh.f32 %v4598_v28 }
 0x1ff   : > { %3120 = vmatmul.msk.f32.gmra.mxu1 %vm295_vm0, %v3601_v54  ;;  %3177 = vmatmul.msk.f32.gmra.mxu2 %vm295_vm0, %v1197_v39 }
 0x202   : > { %v1490_v26 = vpop.f32.mrf.mxu2 }
 0x203   : > { %v3603_v58 = vpop.eup %3602  ;;  %v4610_v10 = vadd.f32 %v4428_v2, %v1490_v26 }
 0x204   : > { %v1062_v6 = vpop.f32.mrf.mxu1  ;;  %3232 = vmatmul.msk.f32.gmra.mxu3 %vm295_vm0, %v3603_v58  ;;  %v3605_v20 = vpop.eup %3604 }
 0x205   : > { %3606 = vtanh.f32 %v4610_v10  ;;  %v1198_v8 = vadd.f32 %v1062_v6, %v4358_v47  ;;  %v4655_v26 = vpop.f32.mrf.mxu3 }
 0x206   : > { %3608 = vtanh.f32 %v4614_v45 }
 0x207   : > { %3121 = vmatmul.msk.f32.gmra.mxu1 %vm295_vm0, %v3605_v20  ;;  %3178 = vmatmul.msk.f32.gmra.mxu2 %vm295_vm0, %v1198_v8 }
 0x20a   : > { %v1493_v50 = vpop.f32.mrf.mxu2 }
 0x20b   : > { %v3607_v22 = vpop.eup %3606  ;;  %v4625_v40 = vadd.f32 %v4428_v2, %v1493_v50 }
 0x20c   : > { %v1065_v19 = vpop.f32.mrf.mxu1  ;;  %3233 = vmatmul.msk.f32.gmra.mxu3 %vm295_vm0, %v3607_v22  ;;  %v3609_v56 = vpop.eup %3608 }
 0x20d   : > { %3610 = vtanh.f32 %v4625_v40  ;;  %v1199_v47 = vadd.f32 %v1065_v19, %v4370_v62  ;;  %v4647_v62 = vadd.f32 %v4032_v53, %v4414_v57  ;;  %v4663_v57 = vld [vmem:[%s5553_s2] ss:$0 sm:$0xff] }
 0x20e   : > { %3612 = vtanh.f32 %v4629_v31  ;;  %v4682_v38 = vadd.f32 %v4663_v57, %v4416_v36  ;;  %v4695_v36 = vadd.f32 %v4663_v57, %v4434_v18 }
 0x20f   : > { %3122 = vmatmul.msk.f32.gmra.mxu1 %vm295_vm0, %v3609_v56  ;;  %3179 = vmatmul.msk.f32.gmra.mxu2 %vm295_vm0, %v1199_v47 }
 0x212   : > { %v1496_v34 = vpop.f32.mrf.mxu2 }
 0x213   : > { %v3611_v16 = vpop.eup %3610  ;;  %v4643_v46 = vadd.f32 %v4428_v2, %v1496_v34 }
 0x214   : > { %v1068_v39 = vpop.f32.mrf.mxu1  ;;  %3234 = vmatmul.msk.f32.gmra.mxu3 %vm295_vm0, %v3611_v16  ;;  %v3613_v54 = vpop.eup %3612 }
 0x215   : > { %3614 = vtanh.f32 %v4643_v46  ;;  %v1200_v13 = vadd.f32 %v1068_v39, %v4382_v7  ;;  %v4667_v7 = vadd.f32 %v4663_v57, %v4400_v5  ;;  %v4678_v5 = vpop.f32.mrf.mxu3 }
 0x216   : > { %3616 = vtanh.f32 %v4647_v62 }
 0x217   : > { %3123 = vmatmul.msk.f32.gmra.mxu1 %vm295_vm0, %v3613_v54  ;;  %3180 = vmatmul.msk.f32.gmra.mxu2 %vm295_vm0, %v1200_v13 }
 0x21a   : > { %v1499_v58 = vpop.f32.mrf.mxu2 }
 0x21b   : > { %v3615_v6 = vpop.eup %3614  ;;  %v4658_v53 = vadd.f32 %v4428_v2, %v1499_v58 }
 0x21c   : > { %v1071_v8 = vpop.f32.mrf.mxu1  ;;  %3235 = vmatmul.msk.f32.gmra.mxu3 %vm295_vm0, %v3615_v6  ;;  %v3617_v50 = vpop.eup %3616 }
 0x21d   : > { %3618 = vtanh.f32 %v4658_v53  ;;  %v1201_v20 = vadd.f32 %v1071_v8, %v4393_v59  ;;  %v4700_v58 = vpop.f32.mrf.mxu3 }
 0x21e   : > { %3620 = vtanh.f32 %v4667_v7 }
 0x21f   : > { %3124 = vmatmul.msk.f32.gmra.mxu1 %vm295_vm0, %v3617_v50  ;;  %3181 = vmatmul.msk.f32.gmra.mxu2 %vm295_vm0, %v1201_v20  ;;  %v4710_v50 = vadd.f32 %v4663_v57, %v4458_v52 }
 0x222   : > { %v1502_v22 = vpop.f32.mrf.mxu2 }
 0x223   : > { %v3619_v19 = vpop.eup %3618  ;;  %v4676_v47 = vadd.f32 %v4428_v2, %v1502_v22 }
 0x224   : > { %v1074_v56 = vpop.f32.mrf.mxu1  ;;  %3236 = vmatmul.msk.f32.gmra.mxu3 %vm295_vm0, %v3619_v19  ;;  %v3621_v34 = vpop.eup %3620 }
 0x225   : > { %3622 = vtanh.f32 %v4676_v47  ;;  %v1202_v59 = vadd.f32 %v1074_v56, %v4405_v30 }
 0x226   : > { %3624 = vtanh.f32 %v4682_v38 }
 0x227   : > { %3125 = vmatmul.msk.f32.gmra.mxu1 %vm295_vm0, %v3621_v34  ;;  %3182 = vmatmul.msk.f32.gmra.mxu2 %vm295_vm0, %v1202_v59 }
 0x22a   : > { %v1505_v16 = vpop.f32.mrf.mxu2 }
 0x22b   : > { %v3623_v39 = vpop.eup %3622  ;;  %v4691_v13 = vadd.f32 %v4428_v2, %v1505_v16 }
 0x22c   : > { %v1077_v54 = vpop.f32.mrf.mxu1  ;;  %3237 = vmatmul.msk.f32.gmra.mxu3 %vm295_vm0, %v3623_v39  ;;  %v3625_v6 = vpop.eup %3624 }
 0x22d   : > { %3626 = vtanh.f32 %v4691_v13  ;;  %v1203_v30 = vadd.f32 %v1077_v54, %v4420_v9 }
 0x22e   : > { %3628 = vtanh.f32 %v4695_v36 }
 0x22f   : > { %3126 = vmatmul.msk.f32.gmra.mxu1 %vm295_vm0, %v3625_v6  ;;  %3183 = vmatmul.msk.f32.gmra.mxu2 %vm295_vm0, %v1203_v30 }
 0x232   : > { %v1508_v8 = vpop.f32.mrf.mxu2 }
 0x233   : > { %v3627_v20 = vpop.eup %3626  ;;  %v4706_v18 = vadd.f32 %v4428_v2, %v1508_v8 }
 0x234   : > { %v1080_v22 = vpop.f32.mrf.mxu1  ;;  %3238 = vmatmul.msk.f32.gmra.mxu3 %vm295_vm0, %v3627_v20  ;;  %v3629_v19 = vpop.eup %3628 }
 0x235   : > { %3630 = vtanh.f32 %v4706_v18  ;;  %v1204_v9 = vadd.f32 %v1080_v22, %v4438_v29  ;;  %v4725_v29 = vadd.f32 %v4663_v57, %v4478_v44 }
 0x236   : > { %3632 = vtanh.f32 %v4710_v50 }
 0x237   : > { %3127 = vmatmul.msk.f32.gmra.mxu1 %vm295_vm0, %v3629_v19  ;;  %3184 = vmatmul.msk.f32.gmra.mxu2 %vm295_vm0, %v1204_v9  ;;  %v1931_v56 = vpop.f32.mrf.mxu3 }
 0x238   : > { %v2123_v59 = vadd.f32 %v1931_v56, %v4432_v41 }
 0x23a   : > { %v1511_v34 = vpop.f32.mrf.mxu2  ;;  %3295 = vmatmul.msk.f32.vlgmr.msrb.gmra.mxu0 %vm295_vm0, %v2123_v59 }
 0x23b   : > { %v3631_v52 = vpop.eup %3630  ;;  %v4721_v16 = vadd.f32 %v4428_v2, %v1511_v34 }
 0x23c   : > { %v1083_v39 = vpop.f32.mrf.mxu1  ;;  %3239 = vmatmul.msk.f32.gmra.mxu3 %vm295_vm0, %v3631_v52  ;;  %v3633_v30 = vpop.eup %3632 }
 0x23d   : > { %3634 = vtanh.f32 %v4721_v16  ;;  %v1205_v54 = vadd.f32 %v1083_v39, %v4453_v35  ;;  %v4740_v35 = vadd.f32 %v4663_v57, %v4494_v24 }
 0x23e   : > { %3636 = vtanh.f32 %v4725_v29 }
 0x23f   : > { %3128 = vmatmul.msk.f32.gmra.mxu1 %vm295_vm0, %v3633_v30  ;;  %3185 = vmatmul.msk.f32.gmra.mxu2 %vm295_vm0, %v1205_v54  ;;  %v1934_v41 = vpop.f32.mrf.mxu3 }
 0x240   : > { %v2124_v6 = vadd.f32 %v1934_v41, %v4449_v17 }
 0x242   : > { %v1514_v8 = vpop.f32.mrf.mxu2  ;;  %3296 = vmatmul.msk.f32.gmra.mxu0 %vm295_vm0, %v2124_v6 }
 0x243   : > { %v3635_v44 = vpop.eup %3634  ;;  %v4736_v20 = vadd.f32 %v4428_v2, %v1514_v8 }
 0x244   : > { %v1086_v22 = vpop.f32.mrf.mxu1  ;;  %3240 = vmatmul.msk.f32.gmra.mxu3 %vm295_vm0, %v3635_v44  ;;  %v3637_v19 = vpop.eup %3636 }
 0x245   : > { %3638 = vtanh.f32 %v4736_v20  ;;  %v1206_v9 = vadd.f32 %v1086_v22, %v4468_v55  ;;  %v4755_v55 = vadd.f32 %v4663_v57, %v4515_v32 }
 0x246   : > { %3640 = vtanh.f32 %v4740_v35 }
 0x247   : > { %3129 = vmatmul.msk.f32.gmra.mxu1 %vm295_vm0, %v3637_v19  ;;  %3186 = vmatmul.msk.f32.gmra.mxu2 %vm295_vm0, %v1206_v9  ;;  %v1937_v17 = vpop.f32.mrf.mxu3 }
 0x248   : > { %v2125_v56 = vadd.f32 %v1937_v17, %v4464_v43 }
 0x24a   : > { %v1517_v59 = vpop.f32.mrf.mxu2  ;;  %3297 = vmatmul.msk.f32.gmra.mxu0 %vm295_vm0, %v2125_v56 }
 0x24b   : > { %v3639_v24 = vpop.eup %3638  ;;  %v4751_v34 = vadd.f32 %v4428_v2, %v1517_v59 }
 0x24c   : > { %v1089_v52 = vpop.f32.mrf.mxu1  ;;  %3241 = vmatmul.msk.f32.gmra.mxu3 %vm295_vm0, %v3639_v24  ;;  %v3641_v54 = vpop.eup %3640 }
 0x24d   : > { %3642 = vtanh.f32 %v4751_v34  ;;  %v1207_v39 = vadd.f32 %v1089_v52, %v4486_v1  ;;  %v4770_v1 = vadd.f32 %v4663_v57, %v4537_v42 }
 0x24e   : > { %3644 = vtanh.f32 %v4755_v55 }
 0x24f   : > { %3130 = vmatmul.msk.f32.gmra.mxu1 %vm295_vm0, %v3641_v54  ;;  %3187 = vmatmul.msk.f32.gmra.mxu2 %vm295_vm0, %v1207_v39  ;;  %v1940_v43 = vpop.f32.mrf.mxu3 }
 0x250   : > { %v2126_v30 = vadd.f32 %v1940_v43, %v4482_v27 }
 0x252   : > { %v1520_v41 = vpop.f32.mrf.mxu2  ;;  %3298 = vmatmul.msk.f32.gmra.mxu0 %vm295_vm0, %v2126_v30 }
 0x253   : > { %v3643_v32 = vpop.eup %3642  ;;  %v4766_v6 = vadd.f32 %v4428_v2, %v1520_v41 }
 0x254   : > { %v1092_v8 = vpop.f32.mrf.mxu1  ;;  %3242 = vmatmul.msk.f32.gmra.mxu3 %vm295_vm0, %v3643_v32  ;;  %v3645_v22 = vpop.eup %3644 }
 0x255   : > { %3646 = vtanh.f32 %v4766_v6  ;;  %v1208_v44 = vadd.f32 %v1092_v8, %v4501_v4  ;;  %v4785_v4 = vadd.f32 %v4663_v57, %v4557_v3 }
 0x256   : > { %3648 = vtanh.f32 %v4770_v1 }
 0x257   : > { %3131 = vmatmul.msk.f32.gmra.mxu1 %vm295_vm0, %v3645_v22  ;;  %3188 = vmatmul.msk.f32.gmra.mxu2 %vm295_vm0, %v1208_v44  ;;  %v1943_v27 = vpop.f32.mrf.mxu3 }
 0x258   : > { %v2127_v9 = vadd.f32 %v1943_v27, %v4497_v60 }
 0x25a   : > { %v1523_v19 = vpop.f32.mrf.mxu2  ;;  %3299 = vmatmul.msk.f32.gmra.mxu0 %vm295_vm0, %v2127_v9 }
 0x25b   : > { %v3647_v42 = vpop.eup %3646  ;;  %v4781_v17 = vadd.f32 %v4428_v2, %v1523_v19 }
 0x25c   : > { %v1095_v56 = vpop.f32.mrf.mxu1  ;;  %3243 = vmatmul.msk.f32.gmra.mxu3 %vm295_vm0, %v3647_v42  ;;  %v3649_v24 = vpop.eup %3648 }
 0x25d   : > { %3650 = vtanh.f32 %v4781_v17  ;;  %v1209_v59 = vadd.f32 %v1095_v56, %v4519_v12  ;;  %v4800_v12 = vadd.f32 %v4663_v57, %v4576_v63 }
 0x25e   : > { %3652 = vtanh.f32 %v4785_v4 }
 0x25f   : > { %3132 = vmatmul.msk.f32.gmra.mxu1 %vm295_vm0, %v3649_v24  ;;  %3189 = vmatmul.msk.f32.gmra.mxu2 %vm295_vm0, %v1209_v59  ;;  %v1946_v60 = vpop.f32.mrf.mxu3 }
 0x260   : > { %v2128_v52 = vadd.f32 %v1946_v60, %v4513_v21 }
 0x262   : > { %v1526_v39 = vpop.f32.mrf.mxu2  ;;  %3300 = vmatmul.msk.f32.gmra.mxu0 %vm295_vm0, %v2128_v52 }
 0x263   : > { %v3651_v3 = vpop.eup %3650  ;;  %v4796_v54 = vadd.f32 %v4428_v2, %v1526_v39 }
 0x264   : > { %v1098_v43 = vpop.f32.mrf.mxu1  ;;  %3244 = vmatmul.msk.f32.gmra.mxu3 %vm295_vm0, %v3651_v3  ;;  %v3653_v41 = vpop.eup %3652 }
 0x265   : > { %3654 = vtanh.f32 %v4796_v54  ;;  %v1210_v30 = vadd.f32 %v1098_v43, %v4532_v33  ;;  %v4815_v33 = vadd.f32 %v4663_v57, %v4594_v15 }
 0x266   : > { %3656 = vtanh.f32 %v4800_v12 }
 0x267   : > { %3133 = vmatmul.msk.f32.gmra.mxu1 %vm295_vm0, %v3653_v41  ;;  %3190 = vmatmul.msk.f32.gmra.mxu2 %vm295_vm0, %v1210_v30  ;;  %v1949_v21 = vpop.f32.mrf.mxu3 }
 0x268   : > { %v2129_v32 = vadd.f32 %v1949_v21, %v4528_v0 }
 0x26a   : > { %v1529_v8 = vpop.f32.mrf.mxu2  ;;  %3301 = vmatmul.msk.f32.gmra.mxu0 %vm295_vm0, %v2129_v32 }
 0x26b   : > { %v3655_v63 = vpop.eup %3654  ;;  %v4811_v44 = vadd.f32 %v4428_v2, %v1529_v8 }
 0x26c   : > { %v1101_v22 = vpop.f32.mrf.mxu1  ;;  %3245 = vmatmul.msk.f32.gmra.mxu3 %vm295_vm0, %v3655_v63  ;;  %v3657_v9 = vpop.eup %3656 }
 0x26d   : > { %3658 = vtanh.f32 %v4811_v44  ;;  %v1211_v27 = vadd.f32 %v1101_v22, %v4550_v23  ;;  %v4830_v23 = vadd.f32 %v4663_v57, %v4619_v25 }
 0x26e   : > { %3660 = vtanh.f32 %v4815_v33 }
 0x26f   : > { %3134 = vmatmul.msk.f32.gmra.mxu1 %vm295_vm0, %v3657_v9  ;;  %3191 = vmatmul.msk.f32.gmra.mxu2 %vm295_vm0, %v1211_v27  ;;  %v1952_v0 = vpop.f32.mrf.mxu3 }
 0x270   : > { %v2130_v19 = vadd.f32 %v1952_v0, %v4546_v61 }
 0x272   : > { %v1532_v42 = vpop.f32.mrf.mxu2  ;;  %3302 = vmatmul.msk.f32.gmra.mxu0 %vm295_vm0, %v2130_v19 }
 0x273   : > { %v3659_v15 = vpop.eup %3658  ;;  %v4826_v56 = vadd.f32 %v4428_v2, %v1532_v42 }
 0x274   : > { %v1104_v59 = vpop.f32.mrf.mxu1  ;;  %3246 = vmatmul.msk.f32.gmra.mxu3 %vm295_vm0, %v3659_v15  ;;  %v3661_v60 = vpop.eup %3660 }
 0x275   : > { %3662 = vtanh.f32 %v4826_v56  ;;  %v1212_v24 = vadd.f32 %v1104_v59, %v4565_v11  ;;  %v4845_v11 = vadd.f32 %v4663_v57, %v4639_v14 }
 0x276   : > { %3664 = vtanh.f32 %v4830_v23 }
 0x277   : > { %3135 = vmatmul.msk.f32.gmra.mxu1 %vm295_vm0, %v3661_v60  ;;  %3192 = vmatmul.msk.f32.gmra.mxu2 %vm295_vm0, %v1212_v24  ;;  %v1955_v61 = vpop.f32.mrf.mxu3 }
 0x278   : > { %v2131_v52 = vadd.f32 %v1955_v61, %v4561_v51 }
 0x27a   : > { %v1535_v39 = vpop.f32.mrf.mxu2  ;;  %3303 = vmatmul.msk.f32.gmra.mxu0 %vm295_vm0, %v2131_v52 }
 0x27b   : > { %v3663_v25 = vpop.eup %3662  ;;  %v4841_v3 = vadd.f32 %v4428_v2, %v1535_v39 }
 0x27c   : > { %v1107_v43 = vpop.f32.mrf.mxu1  ;;  %3247 = vmatmul.msk.f32.gmra.mxu3 %vm295_vm0, %v3663_v25  ;;  %v3665_v41 = vpop.eup %3664 }
 0x27d   : > { %3666 = vtanh.f32 %v4841_v3  ;;  %v1213_v30 = vadd.f32 %v1107_v43, %v4583_v48  ;;  %v4860_v48 = vadd.f32 %v4663_v57, %v4655_v26 }
 0x27e   : > { %3668 = vtanh.f32 %v4845_v11 }
 0x27f   : > { %3136 = vmatmul.msk.f32.gmra.mxu1 %vm295_vm0, %v3665_v41  ;;  %3193 = vmatmul.msk.f32.gmra.mxu2 %vm295_vm0, %v1213_v30  ;;  %v1958_v51 = vpop.f32.mrf.mxu3 }
 0x280   : > { %v2132_v21 = vadd.f32 %v1958_v51, %v4579_v37 }
 0x282   : > { %v1538_v32 = vpop.f32.mrf.mxu2  ;;  %3304 = vmatmul.msk.f32.gmra.mxu0 %vm295_vm0, %v2132_v21 }
 0x283   : > { %v3667_v14 = vpop.eup %3666  ;;  %v4856_v8 = vadd.f32 %v4428_v2, %v1538_v32 }
 0x284   : > { %v1110_v63 = vpop.f32.mrf.mxu1  ;;  %3248 = vmatmul.msk.f32.gmra.mxu3 %vm295_vm0, %v3667_v14  ;;  %v3669_v27 = vpop.eup %3668 }
 0x285   : > { %3670 = vtanh.f32 %v4856_v8  ;;  %v1214_v22 = vadd.f32 %v1110_v63, %v4598_v28  ;;  %v4875_v28 = vadd.f32 %v4663_v57, %v4678_v5 }
 0x286   : > { %3672 = vtanh.f32 %v4860_v48 }
 0x287   : > { %3137 = vmatmul.msk.f32.gmra.mxu1 %vm295_vm0, %v3669_v27  ;;  %3194 = vmatmul.msk.f32.gmra.mxu2 %vm295_vm0, %v1214_v22  ;;  %v1961_v37 = vpop.f32.mrf.mxu3 }
 0x288   : > { %v2133_v9 = vadd.f32 %v1961_v37, %v4592_v49 }
 0x28a   : > { %v1541_v0 = vpop.f32.mrf.mxu2  ;;  %3305 = vmatmul.msk.f32.gmra.mxu0 %vm295_vm0, %v2133_v9 }
 0x28b   : > { %v3671_v26 = vpop.eup %3670  ;;  %v4871_v19 = vadd.f32 %v4428_v2, %v1541_v0 }
 0x28c   : > { %v1113_v42 = vpop.f32.mrf.mxu1  ;;  %3249 = vmatmul.msk.f32.gmra.mxu3 %vm295_vm0, %v3671_v26  ;;  %v3673_v59 = vpop.eup %3672 }
 0x28d   : > { %3674 = vtanh.f32 %v4871_v19  ;;  %v1215_v15 = vadd.f32 %v1113_v42, %v4614_v45  ;;  %v4890_v45 = vadd.f32 %v4663_v57, %v4700_v58 }
 0x28e   : > { %3676 = vtanh.f32 %v4875_v28 }
 0x28f   : > { %3138 = vmatmul.msk.f32.gmra.mxu1 %vm295_vm0, %v3673_v59  ;;  %3195 = vmatmul.msk.f32.gmra.mxu2 %vm295_vm0, %v1215_v15  ;;  %v1964_v49 = vpop.f32.mrf.mxu3 }
 0x290   : > { %v2134_v24 = vadd.f32 %v1964_v49, %v4610_v10 }
 0x292   : > { %v1544_v60 = vpop.f32.mrf.mxu2  ;;  %3306 = vmatmul.msk.f32.gmra.mxu0 %vm295_vm0, %v2134_v24 }
 0x293   : > { %v3675_v5 = vpop.eup %3674  ;;  %v4886_v61 = vadd.f32 %v4428_v2, %v1544_v60 }
 0x294   : > { %v1116_v52 = vpop.f32.mrf.mxu1  ;;  %3250 = vmatmul.msk.f32.gmra.mxu3 %vm295_vm0, %v3675_v5  ;;  %v3677_v25 = vpop.eup %3676 }
 0x295   : > { %3678 = vtanh.f32 %v4886_v61  ;;  %v1216_v39 = vadd.f32 %v1116_v52, %v4629_v31 }
 0x296   : > { %3680 = vtanh.f32 %v4890_v45 }
 0x297   : > { %3139 = vmatmul.msk.f32.gmra.mxu1 %vm295_vm0, %v3677_v25  ;;  %3196 = vmatmul.msk.f32.gmra.mxu2 %vm295_vm0, %v1216_v39  ;;  %v1967_v10 = vpop.f32.mrf.mxu3 }
 0x298   : > { %v2135_v43 = vadd.f32 %v1967_v10, %v4625_v40 }
 0x29a   : > { %v1547_v30 = vpop.f32.mrf.mxu2  ;;  %3307 = vmatmul.msk.f32.gmra.mxu0 %vm295_vm0, %v2135_v43 }
 0x29b   : > { %v3679_v57 = vpop.eup %3678  ;;  %v4901_v58 = vadd.f32 %v4428_v2, %v1547_v30 }
 0x29c   : > { %v1119_v41 = vpop.f32.mrf.mxu1  ;;  %3251 = vmatmul.msk.f32.gmra.mxu3 %vm295_vm0, %v3679_v57  ;;  %v3681_v51 = vpop.eup %3680 }
 0x29d   : > { %3682 = vtanh.f32 %v4901_v58  ;;  %v1217_v31 = vadd.f32 %v1119_v41, %v4647_v62 }
 0x29f   : > { %3140 = vmatmul.msk.f32.gmra.mxu1 %vm295_vm0, %v3681_v51  ;;  %3197 = vmatmul.msk.f32.gmra.mxu2 %vm295_vm0, %v1217_v31  ;;  %v1970_v40 = vpop.f32.mrf.mxu3 }
 0x2a0   : > { %v2136_v21 = vadd.f32 %v1970_v40, %v4643_v46 }
 0x2a2   : > { %v1550_v32 = vpop.f32.mrf.mxu2  ;;  %3308 = vmatmul.msk.f32.gmra.mxu0 %vm295_vm0, %v2136_v21 }
 0x2a3   : > { %v3683_v14 = vpop.eup %3682  ;;  %v4911_v63 = vadd.f32 %v4428_v2, %v1550_v32 }
 0x2a4   : > { %v1122_v22 = vpop.f32.mrf.mxu1  ;;  %3252 = vmatmul.msk.f32.gmra.mxu3 %vm295_vm0, %v3683_v14 }
 0x2a5   : > { %3684 = vtanh.f32 %v4911_v63  ;;  %v1218_v62 = vadd.f32 %v1122_v22, %v4667_v7 }
 0x2a7   : > { %3198 = vmatmul.msk.f32.gmra.mxu2 %vm295_vm0, %v1218_v62  ;;  %v1973_v27 = vpop.f32.mrf.mxu3 }
 0x2a8   : > { %v2137_v46 = vadd.f32 %v1973_v27, %v4658_v53 }
 0x2aa   : > { %v1553_v37 = vpop.f32.mrf.mxu2  ;;  %3309 = vmatmul.msk.f32.gmra.mxu0 %vm295_vm0, %v2137_v46 }
 0x2ab   : > { %v3685_v9 = vpop.eup %3684  ;;  %v4920_v0 = vadd.f32 %v4428_v2, %v1553_v37 }
 0x2ac   : > { %v1125_v26 = vpop.f32.mrf.mxu1  ;;  %3253 = vmatmul.msk.f32.gmra.mxu3 %vm295_vm0, %v3685_v9 }
 0x2ad   : > { %3686 = vtanh.f32 %v4920_v0  ;;  %v1219_v42 = vadd.f32 %v1125_v26, %v4682_v38  ;;  %v4936_v38 = vld [vmem:[%s5553_s2 + $0x2] ss:$0 sm:$0xff] }
 0x2af   : > { %3199 = vmatmul.msk.f32.gmra.mxu2 %vm295_vm0, %v1219_v42  ;;  %v1976_v7 = vpop.f32.mrf.mxu3 }
 0x2b0   : > { %v2138_v15 = vadd.f32 %v1976_v7, %v4676_v47 }
 0x2b2   : > { %v1556_v53 = vpop.f32.mrf.mxu2  ;;  %3310 = vmatmul.msk.f32.gmra.mxu0 %vm295_vm0, %v2138_v15 }
 0x2b3   : > { %v3687_v59 = vpop.eup %3686  ;;  %v4930_v49 = vadd.f32 %v4428_v2, %v1556_v53  ;;  %v4987_v53 = vld [vmem:[%s5553_s2 + $0x1] ss:$0 sm:$0xff] }
 0x2b4   : > { %v1128_v24 = vpop.f32.mrf.mxu1  ;;  %3254 = vmatmul.msk.f32.gmra.mxu3 %vm295_vm0, %v3687_v59 }
 0x2b5   : > { %3688 = vtanh.f32 %v4930_v49  ;;  %v1220_v47 = vadd.f32 %v1128_v24, %v4695_v36 }
 0x2b7   : > { %3200 = vmatmul.msk.f32.gmra.mxu2 %vm295_vm0, %v1220_v47  ;;  %v1979_v60 = vpop.f32.mrf.mxu3  ;;  %v2410_v5 = vpop.f32.mrf.mxu0 }
 0x2b8   : > { %v2139_v52 = vadd.f32 %v1979_v60, %v4691_v13  ;;  %v2411_v39 = vadd.f32 %v4936_v38, %v2410_v5 }
 0x2ba   : > { %2602 = vst.msk [vmem:[%s4943_s15] sm:$0xff] %vm295_vm0, %v2411_v39  ;;  %v1559_v25 = vpop.f32.mrf.mxu2  ;;  %3311 = vmatmul.msk.f32.gmra.mxu0 %vm295_vm0, %v2139_v52 }
 0x2bb   : > { %v3689_v10 = vpop.eup %3688  ;;  %v4949_v36 = vadd.f32 %v4428_v2, %v1559_v25 }
 0x2bc   : > { %v1131_v43 = vpop.f32.mrf.mxu1  ;;  %3255 = vmatmul.msk.f32.gmra.mxu3 %vm295_vm0, %v3689_v10 }
 0x2bd   : > { %3690 = vtanh.f32 %v4949_v36  ;;  %v1221_v13 = vadd.f32 %v1131_v43, %v4710_v50 }
 0x2bf   : > { %3201 = vmatmul.msk.f32.gmra.mxu2 %vm295_vm0, %v1221_v13  ;;  %v1982_v30 = vpop.f32.mrf.mxu3  ;;  %v2413_v57 = vpop.f32.mrf.mxu0 }
 0x2c0   : > { %v2140_v41 = vadd.f32 %v1982_v30, %v4706_v18  ;;  %v2414_v31 = vadd.f32 %v4936_v38, %v2413_v57 }
 0x2c2   : > { %2603 = vst.msk [vmem:[%s4943_s15 + $0x8] sm:$0xff] %vm295_vm0, %v2414_v31  ;;  %v1562_v51 = vpop.f32.mrf.mxu2  ;;  %3312 = vmatmul.msk.f32.gmra.mxu0 %vm295_vm0, %v2140_v41 }
 0x2c3   : > { %v3691_v40 = vpop.eup %3690  ;;  %v4961_v21 = vadd.f32 %v4428_v2, %v1562_v51 }
 0x2c4   : > { %v1134_v32 = vpop.f32.mrf.mxu1  ;;  %3256 = vmatmul.msk.f32.gmra.mxu3 %vm295_vm0, %v3691_v40 }
 0x2c5   : > { %3692 = vtanh.f32 %v4961_v21  ;;  %v1222_v50 = vadd.f32 %v1134_v32, %v4725_v29 }
 0x2c7   : > { %3202 = vmatmul.msk.f32.gmra.mxu2 %vm295_vm0, %v1222_v50  ;;  %v1985_v18 = vpop.f32.mrf.mxu3  ;;  %v2416_v14 = vpop.f32.mrf.mxu0 }
 0x2c8   : > { %v2141_v22 = vadd.f32 %v1985_v18, %v4721_v16  ;;  %v2417_v62 = vadd.f32 %v4936_v38, %v2416_v14 }
 0x2ca   : > { %2604 = vst.msk [vmem:[%s4943_s15 + $0x10] sm:$0xff] %vm295_vm0, %v2417_v62  ;;  %v1565_v27 = vpop.f32.mrf.mxu2  ;;  %3313 = vmatmul.msk.f32.gmra.mxu0 %vm295_vm0, %v2141_v22 }
 0x2cb   : > { %v3693_v46 = vpop.eup %3692  ;;  %v4973_v37 = vadd.f32 %v4428_v2, %v1565_v27 }
 0x2cc   : > { %v1137_v9 = vpop.f32.mrf.mxu1  ;;  %3257 = vmatmul.msk.f32.gmra.mxu3 %vm295_vm0, %v3693_v46 }
 0x2cd   : > { %3694 = vtanh.f32 %v4973_v37  ;;  %v1223_v29 = vadd.f32 %v1137_v9, %v4740_v35 }
 0x2cf   : > { %3203 = vmatmul.msk.f32.gmra.mxu2 %vm295_vm0, %v1223_v29  ;;  %v1988_v16 = vpop.f32.mrf.mxu3  ;;  %v2419_v26 = vpop.f32.mrf.mxu0 }
 0x2d0   : > { %v2142_v42 = vadd.f32 %v1988_v16, %v4736_v20  ;;  %v2420_v7 = vadd.f32 %v4936_v38, %v2419_v26 }
 0x2d2   : > { %2605 = vst.msk [vmem:[%s4943_s15 + $0x18] sm:$0xff] %vm295_vm0, %v2420_v7  ;;  %v1568_v2 = vpop.f32.mrf.mxu2  ;;  %3314 = vmatmul.msk.f32.gmra.mxu0 %vm295_vm0, %v2142_v42 }
 0x2d3   : > { %v3695_v15 = vpop.eup %3694  ;;  %v4990_v35 = vadd.f32 %v4987_v53, %v1568_v2 }
 0x2d4   : > { %v1140_v59 = vpop.f32.mrf.mxu1  ;;  %3258 = vmatmul.msk.f32.gmra.mxu3 %vm295_vm0, %v3695_v15 }
 0x2d5   : > { %3696 = vtanh.f32 %v4990_v35  ;;  %v1224_v20 = vadd.f32 %v1140_v59, %v4755_v55 }
 0x2d7   : > { %3204 = vmatmul.msk.f32.gmra.mxu2 %vm295_vm0, %v1224_v20  ;;  %v1991_v24 = vpop.f32.mrf.mxu3  ;;  %v2422_v47 = vpop.f32.mrf.mxu0 }
 0x2d8   : > { %v2143_v60 = vadd.f32 %v1991_v24, %v4751_v34  ;;  %v2423_v5 = vadd.f32 %v4936_v38, %v2422_v47 }
 0x2da   : > { %2606 = vst.msk [vmem:[%s4943_s15 + $0x20] sm:$0xff] %vm295_vm0, %v2423_v5  ;;  %v1571_v52 = vpop.f32.mrf.mxu2  ;;  %3315 = vmatmul.msk.f32.gmra.mxu0 %vm295_vm0, %v2143_v60 }
 0x2db   : > { %v3697_v39 = vpop.eup %3696  ;;  %v5002_v25 = vadd.f32 %v4987_v53, %v1571_v52 }
 0x2dc   : > { %v1143_v10 = vpop.f32.mrf.mxu1  ;;  %3259 = vmatmul.msk.f32.gmra.mxu3 %vm295_vm0, %v3697_v39 }
 0x2dd   : > { %3698 = vtanh.f32 %v5002_v25  ;;  %v1225_v55 = vadd.f32 %v1143_v10, %v4770_v1 }
 0x2df   : > { %3205 = vmatmul.msk.f32.gmra.mxu2 %vm295_vm0, %v1225_v55  ;;  %v1994_v34 = vpop.f32.mrf.mxu3  ;;  %v2425_v43 = vpop.f32.mrf.mxu0 }
 0x2e0   : > { %v2144_v13 = vadd.f32 %v1994_v34, %v4766_v6  ;;  %v2426_v30 = vadd.f32 %v4936_v38, %v2425_v43 }
 0x2e2   : > { %2607 = vst.msk [vmem:[%s4943_s15 + $0x28] sm:$0xff] %vm295_vm0, %v2426_v30  ;;  %v1574_v57 = vpop.f32.mrf.mxu2  ;;  %3316 = vmatmul.msk.f32.gmra.mxu0 %vm295_vm0, %v2144_v13 }
 0x2e3   : > { %v3699_v41 = vpop.eup %3698  ;;  %v5014_v31 = vadd.f32 %v4987_v53, %v1574_v57 }
 0x2e4   : > { %v1146_v51 = vpop.f32.mrf.mxu1  ;;  %3260 = vmatmul.msk.f32.gmra.mxu3 %vm295_vm0, %v3699_v41 }
 0x2e5   : > { %3700 = vtanh.f32 %v5014_v31  ;;  %v1226_v1 = vadd.f32 %v1146_v51, %v4785_v4 }
 0x2e7   : > { %3206 = vmatmul.msk.f32.gmra.mxu2 %vm295_vm0, %v1226_v1  ;;  %v1997_v6 = vpop.f32.mrf.mxu3  ;;  %v2428_v40 = vpop.f32.mrf.mxu0 }
 0x2e8   : > { %v2145_v32 = vadd.f32 %v1997_v6, %v4781_v17  ;;  %v2429_v50 = vadd.f32 %v4936_v38, %v2428_v40 }
 0x2ea   : > { %2608 = vst.msk [vmem:[%s4943_s15 + $0x30] sm:$0xff] %vm295_vm0, %v2429_v50  ;;  %v1577_v18 = vpop.f32.mrf.mxu2  ;;  %3317 = vmatmul.msk.f32.gmra.mxu0 %vm295_vm0, %v2145_v32 }
 0x2eb   : > { %v3701_v14 = vpop.eup %3700  ;;  %v5026_v22 = vadd.f32 %v4987_v53, %v1577_v18 }
 0x2ec   : > { %v1149_v62 = vpop.f32.mrf.mxu1  ;;  %3261 = vmatmul.msk.f32.gmra.mxu3 %vm295_vm0, %v3701_v14 }
 0x2ed   : > { %3702 = vtanh.f32 %v5026_v22  ;;  %v1227_v4 = vadd.f32 %v1149_v62, %v4800_v12 }
 0x2ef   : > { %3207 = vmatmul.msk.f32.gmra.mxu2 %vm295_vm0, %v1227_v4  ;;  %v2000_v17 = vpop.f32.mrf.mxu3  ;;  %v2431_v27 = vpop.f32.mrf.mxu0 }
 0x2f0   : > { %v2146_v46 = vadd.f32 %v2000_v17, %v4796_v54  ;;  %v2432_v9 = vadd.f32 %v4936_v38, %v2431_v27 }
 0x2f2   : > { %2609 = vst.msk [vmem:[%s4943_s15 + $0x38] sm:$0xff] %vm295_vm0, %v2432_v9  ;;  %v1580_v29 = vpop.f32.mrf.mxu2  ;;  %3318 = vmatmul.msk.f32.gmra.mxu0 %vm295_vm0, %v2146_v46 }
 0x2f3   : > { %v3703_v16 = vpop.eup %3702  ;;  %v5038_v26 = vadd.f32 %v4987_v53, %v1580_v29 }
 0x2f4   : > { %v1152_v42 = vpop.f32.mrf.mxu1  ;;  %3262 = vmatmul.msk.f32.gmra.mxu3 %vm295_vm0, %v3703_v16 }
 0x2f5   : > { %3704 = vtanh.f32 %v5038_v26  ;;  %v1228_v12 = vadd.f32 %v1152_v42, %v4815_v33 }
 0x2f7   : > { %3208 = vmatmul.msk.f32.gmra.mxu2 %vm295_vm0, %v1228_v12  ;;  %v2003_v54 = vpop.f32.mrf.mxu3  ;;  %v2434_v7 = vpop.f32.mrf.mxu0 }
 0x2f8   : > { %v2147_v2 = vadd.f32 %v2003_v54, %v4811_v44  ;;  %v2435_v15 = vadd.f32 %v4936_v38, %v2434_v7 }
 0x2fa   : > { %2610 = vst.msk [vmem:[%s4943_s15 + $0x40] sm:$0xff] %vm295_vm0, %v2435_v15  ;;  %v1583_v59 = vpop.f32.mrf.mxu2  ;;  %3319 = vmatmul.msk.f32.gmra.mxu0 %vm295_vm0, %v2147_v2 }
 0x2fb   : > { %v3705_v20 = vpop.eup %3704  ;;  %v5050_v24 = vadd.f32 %v4987_v53, %v1583_v59 }
 0x2fc   : > { %v1155_v47 = vpop.f32.mrf.mxu1  ;;  %3263 = vmatmul.msk.f32.gmra.mxu3 %vm295_vm0, %v3705_v20 }
 0x2fd   : > { %3706 = vtanh.f32 %v5050_v24  ;;  %v1229_v33 = vadd.f32 %v1155_v47, %v4830_v23 }
 0x2ff   : > { %3209 = vmatmul.msk.f32.gmra.mxu2 %vm295_vm0, %v1229_v33  ;;  %v2006_v44 = vpop.f32.mrf.mxu3  ;;  %v2437_v60 = vpop.f32.mrf.mxu0 }
 0x300   : > { %v2148_v5 = vadd.f32 %v2006_v44, %v4826_v56  ;;  %v2438_v52 = vadd.f32 %v4936_v38, %v2437_v60 }
 0x302   : > { %2611 = vst.msk [vmem:[%s4943_s15 + $0x48] sm:$0xff] %vm295_vm0, %v2438_v52  ;;  %v1586_v39 = vpop.f32.mrf.mxu2  ;;  %3320 = vmatmul.msk.f32.gmra.mxu0 %vm295_vm0, %v2148_v5 }
 0x303   : > { %v3707_v10 = vpop.eup %3706  ;;  %v5062_v55 = vadd.f32 %v4987_v53, %v1586_v39 }
 0x304   : > { %v1158_v34 = vpop.f32.mrf.mxu1  ;;  %3264 = vmatmul.msk.f32.gmra.mxu3 %vm295_vm0, %v3707_v10 }
 0x305   : > { %3708 = vtanh.f32 %v5062_v55  ;;  %v1230_v23 = vadd.f32 %v1158_v34, %v4845_v11 }
 0x307   : > { %3210 = vmatmul.msk.f32.gmra.mxu2 %vm295_vm0, %v1230_v23  ;;  %v2009_v56 = vpop.f32.mrf.mxu3  ;;  %v2440_v43 = vpop.f32.mrf.mxu0 }
 0x308   : > { %v2149_v13 = vadd.f32 %v2009_v56, %v4841_v3  ;;  %v2441_v30 = vadd.f32 %v4936_v38, %v2440_v43 }
 0x30a   : > { %2612 = vst.msk [vmem:[%s4943_s15 + $0x50] sm:$0xff] %vm295_vm0, %v2441_v30  ;;  %v1589_v57 = vpop.f32.mrf.mxu2  ;;  %3321 = vmatmul.msk.f32.gmra.mxu0 %vm295_vm0, %v2149_v13 }
 0x30b   : > { %v3709_v41 = vpop.eup %3708  ;;  %v5074_v51 = vadd.f32 %v4987_v53, %v1589_v57 }
 0x30c   : > { %v1161_v1 = vpop.f32.mrf.mxu1  ;;  %3265 = vmatmul.msk.f32.gmra.mxu3 %vm295_vm0, %v3709_v41 }
 0x30d   : > { %3710 = vtanh.f32 %v5074_v51  ;;  %v1231_v11 = vadd.f32 %v1161_v1, %v4860_v48 }
 0x30f   : > { %3211 = vmatmul.msk.f32.gmra.mxu2 %vm295_vm0, %v1231_v11  ;;  %v2012_v3 = vpop.f32.mrf.mxu3  ;;  %v2443_v6 = vpop.f32.mrf.mxu0 }
 0x310   : > { %v2150_v40 = vadd.f32 %v2012_v3, %v4856_v8  ;;  %v2444_v32 = vadd.f32 %v4936_v38, %v2443_v6 }
 0x312   : > { %2613 = vst.msk [vmem:[%s4943_s15 + $0x58] sm:$0xff] %vm295_vm0, %v2444_v32  ;;  %v1592_v50 = vpop.f32.mrf.mxu2  ;;  %3322 = vmatmul.msk.f32.gmra.mxu0 %vm295_vm0, %v2150_v40 }
 0x313   : > { %v3711_v18 = vpop.eup %3710  ;;  %v5086_v14 = vadd.f32 %v4987_v53, %v1592_v50 }
 0x314   : > { %v1164_v62 = vpop.f32.mrf.mxu1  ;;  %3266 = vmatmul.msk.f32.gmra.mxu3 %vm295_vm0, %v3711_v18 }
 0x315   : > { %3712 = vtanh.f32 %v5086_v14  ;;  %v1232_v48 = vadd.f32 %v1164_v62, %v4875_v28 }
 0x317   : > { %3212 = vmatmul.msk.f32.gmra.mxu2 %vm295_vm0, %v1232_v48  ;;  %v2015_v8 = vpop.f32.mrf.mxu3  ;;  %v2446_v4 = vpop.f32.mrf.mxu0 }
 0x318   : > { %v2151_v17 = vadd.f32 %v2015_v8, %v4871_v19  ;;  %v2447_v27 = vadd.f32 %v4936_v38, %v2446_v4 }
 0x31a   : > { %2614 = vst.msk [vmem:[%s4943_s15 + $0x60] sm:$0xff] %vm295_vm0, %v2447_v27  ;;  %v1595_v46 = vpop.f32.mrf.mxu2  ;;  %3323 = vmatmul.msk.f32.gmra.mxu0 %vm295_vm0, %v2151_v17 }
 0x31b   : > { %v3713_v9 = vpop.eup %3712  ;;  %v5098_v29 = vadd.f32 %v4987_v53, %v1595_v46 }
 0x31c   : > { %v1167_v16 = vpop.f32.mrf.mxu1  ;;  %3267 = vmatmul.msk.f32.gmra.mxu3 %vm295_vm0, %v3713_v9 }
 0x31d   : > { %3714 = vtanh.f32 %v5098_v29  ;;  %v1233_v28 = vadd.f32 %v1167_v16, %v4890_v45 }
 0x31f   : > { %3213 = vmatmul.msk.f32.gmra.mxu2 %vm295_vm0, %v1233_v28  ;;  %v2018_v19 = vpop.f32.mrf.mxu3  ;;  %v2449_v42 = vpop.f32.mrf.mxu0 }
 0x320   : > { %v2152_v12 = vadd.f32 %v2018_v19, %v4886_v61  ;;  %v2450_v54 = vadd.f32 %v4936_v38, %v2449_v42 }
 0x322   : > { %2615 = vst.msk [vmem:[%s4943_s15 + $0x68] sm:$0xff] %vm295_vm0, %v2450_v54  ;;  %v1598_v7 = vpop.f32.mrf.mxu2  ;;  %3324 = vmatmul.msk.f32.gmra.mxu0 %vm295_vm0, %v2152_v12 }
 0x323   : > { %v3715_v2 = vpop.eup %3714  ;;  %v5110_v15 = vadd.f32 %v4987_v53, %v1598_v7 }
 0x324   : > { %3268 = vmatmul.msk.f32.gmra.mxu3 %vm295_vm0, %v3715_v2 }
 0x325   : > { %3716 = vtanh.f32 %v5110_v15 }
 0x327   : > { %v2021_v45 = vpop.f32.mrf.mxu3  ;;  %v2452_v59 = vpop.f32.mrf.mxu0 }
 0x328   : > { %v2153_v61 = vadd.f32 %v2021_v45, %v4901_v58  ;;  %v2453_v20 = vadd.f32 %v4936_v38, %v2452_v59 }
 0x32a   : > { %2616 = vst.msk [vmem:[%s4943_s15 + $0x70] sm:$0xff] %vm295_vm0, %v2453_v20  ;;  %v1601_v47 = vpop.f32.mrf.mxu2  ;;  %3325 = vmatmul.msk.f32.gmra.mxu0 %vm295_vm0, %v2153_v61 }
 0x32b   : > { %v3717_v33 = vpop.eup %3716  ;;  %v5120_v44 = vadd.f32 %v4987_v53, %v1601_v47 }
 0x32c   : > { %3269 = vmatmul.msk.f32.gmra.mxu3 %vm295_vm0, %v3717_v33 }
 0x32d   : > { %3718 = vtanh.f32 %v5120_v44 }
 0x32f   : > { %v2024_v60 = vpop.f32.mrf.mxu3  ;;  %v2455_v5 = vpop.f32.mrf.mxu0 }
 0x330   : > { %v2154_v58 = vadd.f32 %v2024_v60, %v4911_v63  ;;  %v2456_v52 = vadd.f32 %v4936_v38, %v2455_v5 }
 0x332   : > { %2617 = vst.msk [vmem:[%s4943_s15 + $0x78] sm:$0xff] %vm295_vm0, %v2456_v52  ;;  %v1604_v39 = vpop.f32.mrf.mxu2  ;;  %3326 = vmatmul.msk.f32.gmra.mxu0 %vm295_vm0, %v2154_v58 }
 0x333   : > { %v3719_v10 = vpop.eup %3718  ;;  %v5130_v34 = vadd.f32 %v4987_v53, %v1604_v39 }
 0x334   : > { %3270 = vmatmul.msk.f32.gmra.mxu3 %vm295_vm0, %v3719_v10 }
 0x335   : > { %3720 = vtanh.f32 %v5130_v34 }
 0x337   : > { %v2027_v23 = vpop.f32.mrf.mxu3  ;;  %v2458_v56 = vpop.f32.mrf.mxu0 }
 0x338   : > { %v2155_v63 = vadd.f32 %v2027_v23, %v4920_v0  ;;  %v2459_v43 = vadd.f32 %v4936_v38, %v2458_v56 }
 0x33a   : > { %2618 = vst.msk [vmem:[%s4943_s15 + $0x80] sm:$0xff] %vm295_vm0, %v2459_v43  ;;  %v1607_v13 = vpop.f32.mrf.mxu2  ;;  %3327 = vmatmul.msk.f32.gmra.mxu0 %vm295_vm0, %v2155_v63 }
 0x33b   : > { %v3721_v30 = vpop.eup %3720  ;;  %v5140_v57 = vadd.f32 %v4987_v53, %v1607_v13 }
 0x33c   : > { %3271 = vmatmul.msk.f32.gmra.mxu3 %vm295_vm0, %v3721_v30 }
 0x33d   : > { %3722 = vtanh.f32 %v5140_v57 }
 0x33f   : > { %v2030_v41 = vpop.f32.mrf.mxu3  ;;  %v2461_v1 = vpop.f32.mrf.mxu0 }
 0x340   : > { %v2156_v0 = vadd.f32 %v2030_v41, %v4930_v49  ;;  %v2462_v11 = vadd.f32 %v4936_v38, %v2461_v1 }
 0x342   : > { %2619 = vst.msk [vmem:[%s4943_s15 + $0x88] sm:$0xff] %vm295_vm0, %v2462_v11  ;;  %v1610_v3 = vpop.f32.mrf.mxu2  ;;  %3328 = vmatmul.msk.f32.gmra.mxu0 %vm295_vm0, %v2156_v0 }
 0x343   : > { %v3723_v6 = vpop.eup %3722  ;;  %v5150_v40 = vadd.f32 %v4987_v53, %v1610_v3 }
 0x344   : > { %3272 = vmatmul.msk.f32.gmra.mxu3 %vm295_vm0, %v3723_v6 }
 0x345   : > { %3724 = vtanh.f32 %v5150_v40 }
 0x347   : > { %v2033_v32 = vpop.f32.mrf.mxu3  ;;  %v2464_v50 = vpop.f32.mrf.mxu0 }
 0x348   : > { %v2157_v49 = vadd.f32 %v2033_v32, %v4949_v36  ;;  %v2465_v18 = vadd.f32 %v4936_v38, %v2464_v50 }
 0x34a   : > { %2620 = vst.msk [vmem:[%s4943_s15 + $0x90] sm:$0xff] %vm295_vm0, %v2465_v18  ;;  %v1613_v62 = vpop.f32.mrf.mxu2  ;;  %3329 = vmatmul.msk.f32.gmra.mxu0 %vm295_vm0, %v2157_v49 }
 0x34b   : > { %v3725_v48 = vpop.eup %3724  ;;  %v5160_v8 = vadd.f32 %v4987_v53, %v1613_v62 }
 0x34c   : > { %3273 = vmatmul.msk.f32.gmra.mxu3 %vm295_vm0, %v3725_v48 }
 0x34d   : > { %3726 = vtanh.f32 %v5160_v8 }
 0x34f   : > { %v2036_v4 = vpop.f32.mrf.mxu3  ;;  %v2467_v17 = vpop.f32.mrf.mxu0 }
 0x350   : > { %v2158_v36 = vadd.f32 %v2036_v4, %v4961_v21  ;;  %v2468_v27 = vadd.f32 %v4936_v38, %v2467_v17 }
 0x352   : > { %2621 = vst.msk [vmem:[%s4943_s15 + $0x98] sm:$0xff] %vm295_vm0, %v2468_v27  ;;  %v1616_v46 = vpop.f32.mrf.mxu2  ;;  %3330 = vmatmul.msk.f32.gmra.mxu0 %vm295_vm0, %v2158_v36 }
 0x353   : > { %v3727_v9 = vpop.eup %3726  ;;  %v5170_v16 = vadd.f32 %v4987_v53, %v1616_v46 }
 0x354   : > { %3274 = vmatmul.msk.f32.gmra.mxu3 %vm295_vm0, %v3727_v9 }
 0x355   : > { %3728 = vtanh.f32 %v5170_v16 }
 0x357   : > { %v2039_v28 = vpop.f32.mrf.mxu3  ;;  %v2470_v19 = vpop.f32.mrf.mxu0 }
 0x358   : > { %v2159_v21 = vadd.f32 %v2039_v28, %v4973_v37  ;;  %v2471_v42 = vadd.f32 %v4936_v38, %v2470_v19 }
 0x35a   : > { %2622 = vst.msk [vmem:[%s4943_s15 + $0xa0] sm:$0xff] %vm295_vm0, %v2471_v42  ;;  %v1619_v12 = vpop.f32.mrf.mxu2  ;;  %3331 = vmatmul.msk.f32.gmra.mxu0 %vm295_vm0, %v2159_v21 }
 0x35b   : > { %v3729_v54 = vpop.eup %3728  ;;  %v5180_v7 = vadd.f32 %v4987_v53, %v1619_v12 }
 0x35c   : > { %3275 = vmatmul.msk.f32.gmra.mxu3 %vm295_vm0, %v3729_v54 }
 0x35d   : > { %3730 = vtanh.f32 %v5180_v7 }
 0x35f   : > { %v2042_v2 = vpop.f32.mrf.mxu3  ;;  %v2473_v45 = vpop.f32.mrf.mxu0 }
 0x360   : > { %v2160_v37 = vadd.f32 %v2042_v2, %v4990_v35  ;;  %v2474_v59 = vadd.f32 %v4936_v38, %v2473_v45 }
 0x362   : > { %2623 = vst.msk [vmem:[%s4943_s15 + $0xa8] sm:$0xff] %vm295_vm0, %v2474_v59  ;;  %v1622_v61 = vpop.f32.mrf.mxu2  ;;  %3332 = vmatmul.msk.f32.gmra.mxu0 %vm295_vm0, %v2160_v37 }
 0x363   : > { %v3731_v20 = vpop.eup %3730  ;;  %v5190_v47 = vadd.f32 %v4987_v53, %v1622_v61 }
 0x364   : > { %3276 = vmatmul.msk.f32.gmra.mxu3 %vm295_vm0, %v3731_v20 }
 0x365   : > { %3732 = vtanh.f32 %v5190_v47 }
 0x367   : > { %v2045_v33 = vpop.f32.mrf.mxu3  ;;  %v2476_v60 = vpop.f32.mrf.mxu0 }
 0x368   : > { %v2161_v35 = vadd.f32 %v2045_v33, %v5002_v25  ;;  %v2477_v5 = vadd.f32 %v4936_v38, %v2476_v60 }
 0x36a   : > { %2624 = vst.msk [vmem:[%s4943_s15 + $0xb0] sm:$0xff] %vm295_vm0, %v2477_v5  ;;  %v1625_v58 = vpop.f32.mrf.mxu2  ;;  %3333 = vmatmul.msk.f32.gmra.mxu0 %vm295_vm0, %v2161_v35 }
 0x36b   : > { %v3733_v52 = vpop.eup %3732  ;;  %v5200_v39 = vadd.f32 %v4987_v53, %v1625_v58 }
 0x36c   : > { %3277 = vmatmul.msk.f32.gmra.mxu3 %vm295_vm0, %v3733_v52 }
 0x36d   : > { %3734 = vtanh.f32 %v5200_v39 }
 0x36f   : > { %v2048_v10 = vpop.f32.mrf.mxu3  ;;  %v2479_v23 = vpop.f32.mrf.mxu0 }
 0x370   : > { %v2162_v25 = vadd.f32 %v2048_v10, %v5014_v31  ;;  %v2480_v56 = vadd.f32 %v4936_v38, %v2479_v23 }
 0x372   : > { %2625 = vst.msk [vmem:[%s4943_s15 + $0xb8] sm:$0xff] %vm295_vm0, %v2480_v56  ;;  %v1628_v63 = vpop.f32.mrf.mxu2  ;;  %3334 = vmatmul.msk.f32.gmra.mxu0 %vm295_vm0, %v2162_v25 }
 0x373   : > { %v3735_v43 = vpop.eup %3734  ;;  %v5210_v13 = vadd.f32 %v4987_v53, %v1628_v63 }
 0x374   : > { %3278 = vmatmul.msk.f32.gmra.mxu3 %vm295_vm0, %v3735_v43 }
 0x375   : > { %3736 = vtanh.f32 %v5210_v13 }
 0x377   : > { %v2051_v30 = vpop.f32.mrf.mxu3  ;;  %v2482_v41 = vpop.f32.mrf.mxu0 }
 0x378   : > { %v2163_v31 = vadd.f32 %v2051_v30, %v5026_v22  ;;  %v2483_v1 = vadd.f32 %v4936_v38, %v2482_v41 }
 0x37a   : > { %2626 = vst.msk [vmem:[%s4943_s15 + $0xc0] sm:$0xff] %vm295_vm0, %v2483_v1  ;;  %v1631_v0 = vpop.f32.mrf.mxu2  ;;  %3335 = vmatmul.msk.f32.gmra.mxu0 %vm295_vm0, %v2163_v31 }
 0x37b   : > { %v3737_v11 = vpop.eup %3736  ;;  %v5220_v3 = vadd.f32 %v4987_v53, %v1631_v0 }
 0x37c   : > { %3279 = vmatmul.msk.f32.gmra.mxu3 %vm295_vm0, %v3737_v11 }
 0x37d   : > { %3738 = vtanh.f32 %v5220_v3 }
 0x37f   : > { %v2054_v6 = vpop.f32.mrf.mxu3  ;;  %v2485_v32 = vpop.f32.mrf.mxu0 }
 0x380   : > { %v2164_v22 = vadd.f32 %v2054_v6, %v5038_v26  ;;  %v2486_v50 = vadd.f32 %v4936_v38, %v2485_v32 }
 0x382   : > { %2627 = vst.msk [vmem:[%s4943_s15 + $0xc8] sm:$0xff] %vm295_vm0, %v2486_v50  ;;  %v1634_v49 = vpop.f32.mrf.mxu2  ;;  %3336 = vmatmul.msk.f32.gmra.mxu0 %vm295_vm0, %v2164_v22 }
 0x383   : > { %v3739_v18 = vpop.eup %3738  ;;  %v5230_v62 = vadd.f32 %v4987_v53, %v1634_v49 }
 0x384   : > { %3280 = vmatmul.msk.f32.gmra.mxu3 %vm295_vm0, %v3739_v18 }
 0x385   : > { %3740 = vtanh.f32 %v5230_v62 }
 0x387   : > { %v2057_v48 = vpop.f32.mrf.mxu3  ;;  %v2488_v4 = vpop.f32.mrf.mxu0 }
 0x388   : > { %v2165_v26 = vadd.f32 %v2057_v48, %v5050_v24  ;;  %v2489_v17 = vadd.f32 %v4936_v38, %v2488_v4 }
 0x38a   : > { %2628 = vst.msk [vmem:[%s4943_s15 + $0xd0] sm:$0xff] %vm295_vm0, %v2489_v17  ;;  %v1637_v36 = vpop.f32.mrf.mxu2  ;;  %3337 = vmatmul.msk.f32.gmra.mxu0 %vm295_vm0, %v2165_v26 }
 0x38b   : > { %v3741_v27 = vpop.eup %3740  ;;  %v5240_v46 = vadd.f32 %v4987_v53, %v1637_v36 }
 0x38c   : > { %3281 = vmatmul.msk.f32.gmra.mxu3 %vm295_vm0, %v3741_v27 }
 0x38d   : > { %3742 = vtanh.f32 %v5240_v46 }
 0x38f   : > { %v2060_v9 = vpop.f32.mrf.mxu3  ;;  %v2491_v28 = vpop.f32.mrf.mxu0 }
 0x390   : > { %v2166_v24 = vadd.f32 %v2060_v9, %v5062_v55  ;;  %v2492_v19 = vadd.f32 %v4936_v38, %v2491_v28 }
 0x392   : > { %2629 = vst.msk [vmem:[%s4943_s15 + $0xd8] sm:$0xff] %vm295_vm0, %v2492_v19  ;;  %v1640_v21 = vpop.f32.mrf.mxu2  ;;  %3338 = vmatmul.msk.f32.gmra.mxu0 %vm295_vm0, %v2166_v24 }
 0x393   : > { %v3743_v42 = vpop.eup %3742  ;;  %v5250_v12 = vadd.f32 %v4987_v53, %v1640_v21 }
 0x394   : > { %3282 = vmatmul.msk.f32.gmra.mxu3 %vm295_vm0, %v3743_v42 }
 0x395   : > { %3744 = vtanh.f32 %v5250_v12 }
 0x397   : > { %v2063_v54 = vpop.f32.mrf.mxu3  ;;  %v2494_v2 = vpop.f32.mrf.mxu0 }
 0x398   : > { %v2167_v55 = vadd.f32 %v2063_v54, %v5074_v51  ;;  %v2495_v45 = vadd.f32 %v4936_v38, %v2494_v2 }
 0x39a   : > { %2630 = vst.msk [vmem:[%s4943_s15 + $0xe0] sm:$0xff] %vm295_vm0, %v2495_v45  ;;  %v1643_v37 = vpop.f32.mrf.mxu2  ;;  %3339 = vmatmul.msk.f32.gmra.mxu0 %vm295_vm0, %v2167_v55 }
 0x39b   : > { %v3745_v59 = vpop.eup %3744  ;;  %v5260_v61 = vadd.f32 %v4987_v53, %v1643_v37 }
 0x39c   : > { %3283 = vmatmul.msk.f32.gmra.mxu3 %vm295_vm0, %v3745_v59 }
 0x39d   : > { %3746 = vtanh.f32 %v5260_v61 }
 0x39f   : > { %v2066_v20 = vpop.f32.mrf.mxu3  ;;  %v2497_v33 = vpop.f32.mrf.mxu0 }
 0x3a0   : > { %v2168_v51 = vadd.f32 %v2066_v20, %v5086_v14  ;;  %v2498_v60 = vadd.f32 %v4936_v38, %v2497_v33 }
 0x3a2   : > { %2631 = vst.msk [vmem:[%s4943_s15 + $0xe8] sm:$0xff] %vm295_vm0, %v2498_v60  ;;  %v1646_v35 = vpop.f32.mrf.mxu2  ;;  %3340 = vmatmul.msk.f32.gmra.mxu0 %vm295_vm0, %v2168_v51 }
 0x3a3   : > { %v3747_v5 = vpop.eup %3746  ;;  %v5270_v58 = vadd.f32 %v4987_v53, %v1646_v35 }
 0x3a4   : > { %3284 = vmatmul.msk.f32.gmra.mxu3 %vm295_vm0, %v3747_v5 }
 0x3a5   : > { %3748 = vtanh.f32 %v5270_v58 }
 0x3a7   : > { %v2069_v52 = vpop.f32.mrf.mxu3  ;;  %v2500_v10 = vpop.f32.mrf.mxu0 }
 0x3a8   : > { %v2169_v14 = vadd.f32 %v2069_v52, %v5098_v29  ;;  %v2501_v23 = vadd.f32 %v4936_v38, %v2500_v10 }
 0x3aa   : > { %2632 = vst.msk [vmem:[%s4943_s15 + $0xf0] sm:$0xff] %vm295_vm0, %v2501_v23  ;;  %3341 = vmatmul.msk.f32.gmra.mxu0 %vm295_vm0, %v2169_v14 }
 0x3ab   : > { %v3749_v25 = vpop.eup %3748 }
 0x3ac   : > { %3285 = vmatmul.msk.f32.gmra.mxu3 %vm295_vm0, %v3749_v25 }
 0x3af   : > { %v2072_v53 = vpop.f32.mrf.mxu3  ;;  %v2503_v56 = vpop.f32.mrf.mxu0 }
 0x3b0   : > { %v2170_v63 = vadd.f32 %v2072_v53, %v5110_v15  ;;  %v2504_v43 = vadd.f32 %v4936_v38, %v2503_v56 }
 0x3b2   : > { %2633 = vst.msk [vmem:[%s4943_s15 + $0xf8] sm:$0xff] %vm295_vm0, %v2504_v43  ;;  %3342 = vmatmul.msk.f32.gmra.mxu0 %vm295_vm0, %v2170_v63 }
 0x3b7   : > { %v2075_v29 = vpop.f32.mrf.mxu3  ;;  %v2506_v30 = vpop.f32.mrf.mxu0 }
 0x3b8   : > { %v2171_v41 = vadd.f32 %v2075_v29, %v5120_v44  ;;  %v2507_v31 = vadd.f32 %v4936_v38, %v2506_v30 }
 0x3ba   : > { %2634 = vst.msk [vmem:[%s4943_s15 + $0x100] sm:$0xff] %vm295_vm0, %v2507_v31  ;;  %3343 = vmatmul.msk.f32.gmra.mxu0 %vm295_vm0, %v2171_v41 }
 0x3bf   : > { %v2078_v1 = vpop.f32.mrf.mxu3  ;;  %v2509_v15 = vpop.f32.mrf.mxu0 }
 0x3c0   : > { %v2172_v0 = vadd.f32 %v2078_v1, %v5130_v34  ;;  %v2510_v11 = vadd.f32 %v4936_v38, %v2509_v15 }
 0x3c2   : > { %2635 = vst.msk [vmem:[%s4943_s15 + $0x108] sm:$0xff] %vm295_vm0, %v2510_v11  ;;  %3344 = vmatmul.msk.f32.gmra.mxu0 %vm295_vm0, %v2172_v0 }
 0x3c7   : > { %v2081_v6 = vpop.f32.mrf.mxu3  ;;  %v2512_v44 = vpop.f32.mrf.mxu0 }
 0x3c8   : > { %v2173_v32 = vadd.f32 %v2081_v6, %v5140_v57  ;;  %v2513_v22 = vadd.f32 %v4936_v38, %v2512_v44 }
 0x3ca   : > { %2636 = vst.msk [vmem:[%s4943_s15 + $0x110] sm:$0xff] %vm295_vm0, %v2513_v22  ;;  %3345 = vmatmul.msk.f32.gmra.mxu0 %vm295_vm0, %v2173_v32 }
 0x3cf   : > { %v2084_v50 = vpop.f32.mrf.mxu3  ;;  %v2515_v34 = vpop.f32.mrf.mxu0 }
 0x3d0   : > { %v2174_v49 = vadd.f32 %v2084_v50, %v5150_v40  ;;  %v2516_v18 = vadd.f32 %v4936_v38, %v2515_v34 }
 0x3d2   : > { %2637 = vst.msk [vmem:[%s4943_s15 + $0x118] sm:$0xff] %vm295_vm0, %v2516_v18  ;;  %3346 = vmatmul.msk.f32.gmra.mxu0 %vm295_vm0, %v2174_v49 }
 0x3d7   : > { %v2087_v48 = vpop.f32.mrf.mxu3  ;;  %v2518_v57 = vpop.f32.mrf.mxu0 }
 0x3d8   : > { %v2175_v4 = vadd.f32 %v2087_v48, %v5160_v8  ;;  %v2519_v26 = vadd.f32 %v4936_v38, %v2518_v57 }
 0x3da   : > { %2638 = vst.msk [vmem:[%s4943_s15 + $0x120] sm:$0xff] %vm295_vm0, %v2519_v26  ;;  %3347 = vmatmul.msk.f32.gmra.mxu0 %vm295_vm0, %v2175_v4 }
 0x3df   : > { %v2090_v17 = vpop.f32.mrf.mxu3  ;;  %v2521_v40 = vpop.f32.mrf.mxu0 }
 0x3e0   : > { %v2176_v36 = vadd.f32 %v2090_v17, %v5170_v16  ;;  %v2522_v27 = vadd.f32 %v4936_v38, %v2521_v40  ;;  %v3752_v17 = vld [vmem:[%s5553_s2 + $0x2] ss:$0 sm:$0xff] }
 0x3e2   : > { %2639 = vst.msk [vmem:[%s4943_s15 + $0x128] sm:$0xff] %vm295_vm0, %v2522_v27  ;;  %3348 = vmatmul.msk.f32.gmra.mxu0 %vm295_vm0, %v2176_v36 }
 0x3e7   : > { %v2093_v9 = vpop.f32.mrf.mxu3  ;;  %v2524_v8 = vpop.f32.mrf.mxu0 }
 0x3e8   : > { %v2177_v28 = vadd.f32 %v2093_v9, %v5180_v7  ;;  %v2525_v24 = vadd.f32 %v4936_v38, %v2524_v8 }
 0x3ea   : > { %2640 = vst.msk [vmem:[%s4943_s15 + $0x130] sm:$0xff] %vm295_vm0, %v2525_v24  ;;  %3349 = vmatmul.msk.f32.gmra.mxu0 %vm295_vm0, %v2177_v28 }
 0x3ef   : > { %v2096_v19 = vpop.f32.mrf.mxu3  ;;  %v2527_v16 = vpop.f32.mrf.mxu0 }
 0x3f0   : > { %v2178_v21 = vadd.f32 %v2096_v19, %v5190_v47  ;;  %v2528_v42 = vadd.f32 %v4936_v38, %v2527_v16 }
 0x3f2   : > { %2641 = vst.msk [vmem:[%s4943_s15 + $0x138] sm:$0xff] %vm295_vm0, %v2528_v42  ;;  %3350 = vmatmul.msk.f32.gmra.mxu0 %vm295_vm0, %v2178_v21 }
 0x3f7   : > { %v2099_v54 = vpop.f32.mrf.mxu3  ;;  %v2530_v7 = vpop.f32.mrf.mxu0 }
 0x3f8   : > { %v2179_v2 = vadd.f32 %v2099_v54, %v5200_v39  ;;  %v2531_v55 = vadd.f32 %v4936_v38, %v2530_v7 }
 0x3fa   : > { %2642 = vst.msk [vmem:[%s4943_s15 + $0x140] sm:$0xff] %vm295_vm0, %v2531_v55  ;;  %3351 = vmatmul.msk.f32.gmra.mxu0 %vm295_vm0, %v2179_v2 }
 0x3ff   : > { %v2102_v45 = vpop.f32.mrf.mxu3  ;;  %v2533_v47 = vpop.f32.mrf.mxu0 }
 0x400   : > { %v2180_v37 = vadd.f32 %v2102_v45, %v5210_v13  ;;  %v2534_v59 = vadd.f32 %v4936_v38, %v2533_v47 }
 0x402   : > { %2643 = vst.msk [vmem:[%s4943_s15 + $0x148] sm:$0xff] %vm295_vm0, %v2534_v59  ;;  %3352 = vmatmul.msk.f32.gmra.mxu0 %vm295_vm0, %v2180_v37 }
 0x407   : > { %v2105_v20 = vpop.f32.mrf.mxu3  ;;  %v2536_v39 = vpop.f32.mrf.mxu0 }
 0x408   : > { %v2181_v33 = vadd.f32 %v2105_v20, %v5220_v3  ;;  %v2537_v51 = vadd.f32 %v4936_v38, %v2536_v39 }
 0x40a   : > { %2644 = vst.msk [vmem:[%s4943_s15 + $0x150] sm:$0xff] %vm295_vm0, %v2537_v51  ;;  %3353 = vmatmul.msk.f32.gmra.mxu0 %vm295_vm0, %v2181_v33 }
 0x40f   : > { %v2108_v60 = vpop.f32.mrf.mxu3  ;;  %v2539_v13 = vpop.f32.mrf.mxu0 }
 0x410   : > { %v2182_v35 = vadd.f32 %v2108_v60, %v5230_v62  ;;  %v2540_v5 = vadd.f32 %v4936_v38, %v2539_v13 }
 0x412   : > { %2645 = vst.msk [vmem:[%s4943_s15 + $0x158] sm:$0xff] %vm295_vm0, %v2540_v5  ;;  %3354 = vmatmul.msk.f32.gmra.mxu0 %vm295_vm0, %v2182_v35 }
 0x417   : > { %v2111_v52 = vpop.f32.mrf.mxu3  ;;  %v2542_v3 = vpop.f32.mrf.mxu0 }
 0x418   : > { %v2183_v10 = vadd.f32 %v2111_v52, %v5240_v46  ;;  %v2543_v14 = vadd.f32 %v4936_v38, %v2542_v3 }
 0x41a   : > { %2646 = vst.msk [vmem:[%s4943_s15 + $0x160] sm:$0xff] %vm295_vm0, %v2543_v14  ;;  %3355 = vmatmul.msk.f32.gmra.mxu0 %vm295_vm0, %v2183_v10 }
 0x41f   : > { %v2114_v23 = vpop.f32.mrf.mxu3  ;;  %v2545_v62 = vpop.f32.mrf.mxu0 }
 0x420   : > { %v2184_v25 = vadd.f32 %v2114_v23, %v5250_v12  ;;  %v2546_v53 = vadd.f32 %v4936_v38, %v2545_v62 }
 0x422   : > { %2647 = vst.msk [vmem:[%s4943_s15 + $0x168] sm:$0xff] %vm295_vm0, %v2546_v53  ;;  %3356 = vmatmul.msk.f32.gmra.mxu0 %vm295_vm0, %v2184_v25 }
 0x427   : > { %v2117_v56 = vpop.f32.mrf.mxu3  ;;  %v2548_v46 = vpop.f32.mrf.mxu0 }
 0x428   : > { %v2185_v63 = vadd.f32 %v2117_v56, %v5260_v61  ;;  %v2549_v43 = vadd.f32 %v4936_v38, %v2548_v46 }
 0x42a   : > { %2648 = vst.msk [vmem:[%s4943_s15 + $0x170] sm:$0xff] %vm295_vm0, %v2549_v43  ;;  %3357 = vmatmul.msk.f32.gmra.mxu0 %vm295_vm0, %v2185_v63 }
 0x42f   : > { %v2120_v12 = vpop.f32.mrf.mxu3  ;;  %v2551_v29 = vpop.f32.mrf.mxu0 }
 0x430   : > { %v2186_v30 = vadd.f32 %v2120_v12, %v5270_v58  ;;  %v2552_v41 = vadd.f32 %v4936_v38, %v2551_v29 }
 0x432   : > { %2649 = vst.msk [vmem:[%s4943_s15 + $0x178] sm:$0xff] %vm295_vm0, %v2552_v41  ;;  %3358 = vmatmul.msk.f32.gmra.mxu0 %vm295_vm0, %v2186_v30 }
 0x437   : > { %v2554_v61 = vpop.f32.mrf.mxu0 }
 0x438   : > { %v2555_v31 = vadd.f32 %v4936_v38, %v2554_v61 }
 0x43a   : > { %2650 = vst.msk [vmem:[%s4943_s15 + $0x180] sm:$0xff] %vm295_vm0, %v2555_v31 }
 0x43f   : > { %v2557_v1 = vpop.f32.mrf.mxu0 }
 0x440   : > { %v2558_v15 = vadd.f32 %v4936_v38, %v2557_v1 }
 0x442   : > { %2651 = vst.msk [vmem:[%s4943_s15 + $0x188] sm:$0xff] %vm295_vm0, %v2558_v15 }
 0x447   : > { %v2560_v58 = vpop.f32.mrf.mxu0 }
 0x448   : > { %v2561_v0 = vadd.f32 %v4936_v38, %v2560_v58 }
 0x44a   : > { %2652 = vst.msk [vmem:[%s4943_s15 + $0x190] sm:$0xff] %vm295_vm0, %v2561_v0 }
 0x44f   : > { %v2563_v11 = vpop.f32.mrf.mxu0 }
 0x450   : > { %v2564_v6 = vadd.f32 %v4936_v38, %v2563_v11 }
 0x452   : > { %2653 = vst.msk [vmem:[%s4943_s15 + $0x198] sm:$0xff] %vm295_vm0, %v2564_v6 }
 0x457   : > { %v2566_v44 = vpop.f32.mrf.mxu0 }
 0x458   : > { %v2567_v32 = vadd.f32 %v4936_v38, %v2566_v44 }
 0x45a   : > { %2654 = vst.msk [vmem:[%s4943_s15 + $0x1a0] sm:$0xff] %vm295_vm0, %v2567_v32 }
 0x45f   : > { %v2569_v22 = vpop.f32.mrf.mxu0 }
 0x460   : > { %v2570_v50 = vadd.f32 %v4936_v38, %v2569_v22 }
 0x462   : > { %2655 = vst.msk [vmem:[%s4943_s15 + $0x1a8] sm:$0xff] %vm295_vm0, %v2570_v50 }
 0x467   : > { %v2572_v34 = vpop.f32.mrf.mxu0 }
 0x468   : > { %v2573_v49 = vadd.f32 %v4936_v38, %v2572_v34 }
 0x46a   : > { %2656 = vst.msk [vmem:[%s4943_s15 + $0x1b0] sm:$0xff] %vm295_vm0, %v2573_v49 }
 0x46f   : > { %v2575_v18 = vpop.f32.mrf.mxu0 }
 0x470   : > { %v2576_v48 = vadd.f32 %v4936_v38, %v2575_v18 }
 0x472   : > { %2657 = vst.msk [vmem:[%s4943_s15 + $0x1b8] sm:$0xff] %vm295_vm0, %v2576_v48 }
 0x477   : > { %v2578_v57 = vpop.f32.mrf.mxu0 }
 0x478   : > { %v2579_v4 = vadd.f32 %v4936_v38, %v2578_v57 }
 0x47a   : > { %2658 = vst.msk [vmem:[%s4943_s15 + $0x1c0] sm:$0xff] %vm295_vm0, %v2579_v4 }
 0x47f   : > { %v2581_v26 = vpop.f32.mrf.mxu0 }
 0x480   : > { %v2582_v40 = vadd.f32 %v3752_v17, %v2581_v26 }
 0x482   : > { %2659 = vst.msk [vmem:[%s4943_s15 + $0x1c8] sm:$0xff] %vm295_vm0, %v2582_v40 }
 0x487   : > { %v2584_v36 = vpop.f32.mrf.mxu0 }
 0x488   : > { %v2585_v27 = vadd.f32 %v3752_v17, %v2584_v36 }
 0x48a   : > { %2660 = vst.msk [vmem:[%s4943_s15 + $0x1d0] sm:$0xff] %vm295_vm0, %v2585_v27 }
 0x48f   : > { %v2587_v9 = vpop.f32.mrf.mxu0 }
 0x490   : > { %v2588_v8 = vadd.f32 %v3752_v17, %v2587_v9 }
 0x492   : > { %2661 = vst.msk [vmem:[%s4943_s15 + $0x1d8] sm:$0xff] %vm295_vm0, %v2588_v8 }
 0x497   : > { %v2590_v38 = vpop.f32.mrf.mxu0 }
 0x498   : > { %v2591_v28 = vadd.f32 %v3752_v17, %v2590_v38 }
 0x49a   : > { %2662 = vst.msk [vmem:[%s4943_s15 + $0x1e0] sm:$0xff] %vm295_vm0, %v2591_v28 }
 0x49f   : > { %v2593_v24 = vpop.f32.mrf.mxu0 }
 0x4a0   : > { %v2594_v19 = vadd.f32 %v3752_v17, %v2593_v24 }
 0x4a2   : > { %2663 = vst.msk [vmem:[%s4943_s15 + $0x1e8] sm:$0xff] %vm295_vm0, %v2594_v19 }
 0x4a7   : > { %v2596_v16 = vpop.f32.mrf.mxu0 }
 0x4a8   : > { %v2597_v21 = vadd.f32 %v3752_v17, %v2596_v16 }
 0x4aa   : > { %2664 = vst.msk [vmem:[%s4943_s15 + $0x1f0] sm:$0xff] %vm295_vm0, %v2597_v21 }
 0x4ae   : > { %2672 = sbr.rel (!%p3891_p4) target bundleno = 1267 (0x4f3), region = 40 }
 0x4af   : > { %v2599_v42 = vpop.f32.mrf.mxu0 }
 0x4b0   : > { %v2600_v54 = vadd.f32 %v3752_v17, %v2599_v42 }
 0x4b2   : > { %2665 = vst.msk [vmem:[%s4943_s15 + $0x1f8] sm:$0xff] %vm295_vm0, %v2600_v54 }
 0x4b3   : > { %s5566_s5 = smov (!%p2675_p8, %s2674_s5), 64 }
 0x4b4   : > { %s3361_s10 = sshll.u32 %s5566_s5, 3 }
 0x4b5   : > { %p3364_p9 = scmp.eq.s32.totalorder %s3361_s10, 0 }
 0x4b6   : > { %s5422_s11 = sshrl.u32 (!%p3364_p9), %s5566_s5, 5 }
 0x4b7   : > { %2683 = sbr.rel (%p3364_p9) target bundleno = 1267 (0x4f3), region = 44  ;;  %p3365_p10 = scmp.le.s32.totalorder (!%p3364_p9), %s5422_s11, 0 }
 0x4bc   : > { %2962 = sbr.rel (%p3365_p10) target bundleno = 1250 (0x4e2), region = 125  ;;  %s5557_s18 = smov (!%p3365_p10), %s5416_s9 }
 0x4bd   : > { %s5558_s23 = smov (!%p3365_p10), %s4943_s15  ;;  %s5431_s28 = smov (!%p3365_p10), 0  }
 0x4be   : > { %s5433_s12 = smov (!%p3365_p10), 0  }
 0x4c1 LB: >> { %v2808_v7 = vld [vmem:[%s3815_s23] sm:$0xff]  ;;  %v2810_v2 = vld [vmem:[%s3815_s23 + $0x8] sm:$0xff]  ;;  %v2812_v55 = vld [vmem:[%s3815_s23 + $0x10] sm:$0xff]  ;;  %s2872_s13 = sadd.s32 1, %s3819_s28  ;;  %s2802_s12 = sadd.s32 1, %s3823_s12   ;;  %s3823_s12 = sphi %s5433_s12, %s2802_s12   ;;  %s3819_s28 = sphi %s5431_s28, %s5561_s28   ;;  %s3815_s23 = sphi %s5558_s23, %s5560_s23   ;;  %s3811_s18 = sphi %s5557_s18, %s5559_s18  }
 0x4c2   : >> { %2809 = vst [vmem:[%s3811_s18] sm:$0xff] %v2808_v7  ;;  %v2814_v45 = vld [vmem:[%s3815_s23 + $0x18] sm:$0xff]  ;;  %p2873_p11 = scmp.ge.s32.totalorder %s2872_s13, %s5422_s11  ;;  %v2816_v47 = vld [vmem:[%s3815_s23 + $0x20] sm:$0xff]  ;;  %v2818_v37 = vld [vmem:[%s3815_s23 + $0x28] sm:$0xff]  ;;  %p2801_p12 = scmp.ge.s32.totalorder %s2802_s12, %s5422_s11 }
 0x4c3   : >> { %2811 = vst [vmem:[%s3811_s18 + $0x8] sm:$0xff] %v2810_v2  ;;  %v2820_v59 = vld [vmem:[%s3815_s23 + $0x30] sm:$0xff]  ;;  %v2822_v20 = vld [vmem:[%s3815_s23 + $0x38] sm:$0xff]  ;;  %v2824_v39 = vld [vmem:[%s3815_s23 + $0x40] sm:$0xff] }
 0x4c4   : >> { %2813 = vst [vmem:[%s3811_s18 + $0x10] sm:$0xff] %v2812_v55  ;;  %s5568_s13 = smov (%p2873_p11, %s2872_s13), 0  ;;  %v2826_v33 = vld [vmem:[%s3815_s23 + $0x48] sm:$0xff]  ;;  %v2828_v51 = vld [vmem:[%s3815_s23 + $0x50] sm:$0xff]  ;;  %v2830_v60 = vld [vmem:[%s3815_s23 + $0x58] sm:$0xff] }
 0x4c5   : >> { %2815 = vst [vmem:[%s3811_s18 + $0x18] sm:$0xff] %v2814_v45  ;;  %s3366_s14 = sshll.u32 %s5568_s13, 8  ;;  %v2832_v13 = vld [vmem:[%s3815_s23 + $0x60] sm:$0xff]  ;;  %v2834_v35 = vld [vmem:[%s3815_s23 + $0x68] sm:$0xff]  ;;  %v2836_v5 = vld [vmem:[%s3815_s23 + $0x70] sm:$0xff]  ;;  %s5561_s28 = smov %s5568_s13 }
 0x4c6   : >> { %2817 = vst [vmem:[%s3811_s18 + $0x20] sm:$0xff] %v2816_v47  ;;  %s5465_s21 = scalar_lea.vmem %s4943_s15, %s3366_s14 [#allocation2]   ;;  %s5468_s17 = scalar_lea.vmem %s5416_s9, %s3366_s14   ;;  %v2838_v52 = vld [vmem:[%s3815_s23 + $0x78] sm:$0xff]  ;;  %v2840_v3 = vld [vmem:[%s3815_s23 + $0x80] sm:$0xff]  ;;  %v2842_v10 = vld [vmem:[%s3815_s23 + $0x88] sm:$0xff] }
 0x4c7   : >> { %2819 = vst [vmem:[%s3811_s18 + $0x28] sm:$0xff] %v2818_v37  ;;  %v2844_v14 = vld [vmem:[%s3815_s23 + $0x90] sm:$0xff]  ;;  %v2846_v23 = vld [vmem:[%s3815_s23 + $0x98] sm:$0xff]  ;;  %v2848_v62 = vld [vmem:[%s3815_s23 + $0xa0] sm:$0xff] }
 0x4c8   : >> { %2821 = vst [vmem:[%s3811_s18 + $0x30] sm:$0xff] %v2820_v59  ;;  %v2850_v25 = vld [vmem:[%s3815_s23 + $0xa8] sm:$0xff]  ;;  %v2852_v53 = vld [vmem:[%s3815_s23 + $0xb0] sm:$0xff]  ;;  %v2854_v56 = vld [vmem:[%s3815_s23 + $0xb8] sm:$0xff] }
 0x4c9   : >> { %2823 = vst [vmem:[%s3811_s18 + $0x38] sm:$0xff] %v2822_v20  ;;  %v2856_v46 = vld [vmem:[%s3815_s23 + $0xc0] sm:$0xff]  ;;  %v2858_v63 = vld [vmem:[%s3815_s23 + $0xc8] sm:$0xff]  ;;  %v2860_v43 = vld [vmem:[%s3815_s23 + $0xd0] sm:$0xff] }
 0x4ca   : >> { %2825 = vst [vmem:[%s3811_s18 + $0x40] sm:$0xff] %v2824_v39  ;;  %v2862_v12 = vld [vmem:[%s3815_s23 + $0xd8] sm:$0xff]  ;;  %v2864_v29 = vld [vmem:[%s3815_s23 + $0xe0] sm:$0xff]  ;;  %v2866_v30 = vld [vmem:[%s3815_s23 + $0xe8] sm:$0xff] }
 0x4cb   : >> { %2827 = vst [vmem:[%s3811_s18 + $0x48] sm:$0xff] %v2826_v33  ;;  %v2868_v41 = vld [vmem:[%s3815_s23 + $0xf0] sm:$0xff]  ;;  %v2870_v61 = vld [vmem:[%s3815_s23 + $0xf8] sm:$0xff]  ;;  %s5560_s23 = smov %s5465_s21 }
 0x4cc   : >> { %2829 = vst [vmem:[%s3811_s18 + $0x50] sm:$0xff] %v2828_v51 }
 0x4cd   : >> { %2831 = vst [vmem:[%s3811_s18 + $0x58] sm:$0xff] %v2830_v60 }
 0x4ce   : >> { %2833 = vst [vmem:[%s3811_s18 + $0x60] sm:$0xff] %v2832_v13 }
 0x4cf   : >> { %2835 = vst [vmem:[%s3811_s18 + $0x68] sm:$0xff] %v2834_v35 }
 0x4d0   : >> { %2837 = vst [vmem:[%s3811_s18 + $0x70] sm:$0xff] %v2836_v5 }
 0x4d1   : >> { %2839 = vst [vmem:[%s3811_s18 + $0x78] sm:$0xff] %v2838_v52 }
 0x4d2   : >> { %2841 = vst [vmem:[%s3811_s18 + $0x80] sm:$0xff] %v2840_v3 }
 0x4d3   : >> { %2843 = vst [vmem:[%s3811_s18 + $0x88] sm:$0xff] %v2842_v10 }
 0x4d4   : >> { %2845 = vst [vmem:[%s3811_s18 + $0x90] sm:$0xff] %v2844_v14 }
 0x4d5   : >> { %2847 = vst [vmem:[%s3811_s18 + $0x98] sm:$0xff] %v2846_v23 }
 0x4d6   : >> { %2849 = vst [vmem:[%s3811_s18 + $0xa0] sm:$0xff] %v2848_v62 }
 0x4d7   : >> { %2851 = vst [vmem:[%s3811_s18 + $0xa8] sm:$0xff] %v2850_v25 }
 0x4d8   : >> { %2853 = vst [vmem:[%s3811_s18 + $0xb0] sm:$0xff] %v2852_v53 }
 0x4d9   : >> { %2855 = vst [vmem:[%s3811_s18 + $0xb8] sm:$0xff] %v2854_v56 }
 0x4da   : >> { %2857 = vst [vmem:[%s3811_s18 + $0xc0] sm:$0xff] %v2856_v46 }
 0x4db   : >> { %2859 = vst [vmem:[%s3811_s18 + $0xc8] sm:$0xff] %v2858_v63 }
 0x4dc   : >> { %2861 = vst [vmem:[%s3811_s18 + $0xd0] sm:$0xff] %v2860_v43 }
 0x4dd   : >> { %2863 = vst [vmem:[%s3811_s18 + $0xd8] sm:$0xff] %v2862_v12  ;;  %2804 = sbr.rel (!%p2801_p12) target bundleno = 1217 (0x4c1), region = 131 }
 0x4de   : >> { %2865 = vst [vmem:[%s3811_s18 + $0xe0] sm:$0xff] %v2864_v29 }
 0x4df   : >> { %2867 = vst [vmem:[%s3811_s18 + $0xe8] sm:$0xff] %v2866_v30 }
 0x4e0   : >> { %2869 = vst [vmem:[%s3811_s18 + $0xf0] sm:$0xff] %v2868_v41 }
 0x4e1   : >> { %2871 = vst [vmem:[%s3811_s18 + $0xf8] sm:$0xff] %v2870_v61  ;;  %s5559_s18 = smov %s5468_s17 }
 0x4e2 PF: > { %s5533_s20 = sand.u32 31, %s5566_s5   ;;  %s3377_s24 = sshll.u32 %s5422_s11, 8 }
 0x4e3   : > { %s2883_s25 = scalar_lea.vmem %s4943_s15, %s3377_s24 [#allocation2]   ;;  %s2885_s26 = scalar_lea.vmem %s5416_s9, %s3377_s24  }
 0x4e4   : > { %p3371_p13 = scmp.le.s32.totalorder %s5533_s20, 0 }
 0x4e5   : > { %s3825_s27 = smov (!%p3371_p13), %s2885_s26   ;;  %s3829_s29 = smov (!%p3371_p13), %s2883_s25  }
 0x4e6   : > { %2976 = sbr.rel (%p3371_p13) target bundleno = 1267 (0x4f3), region = 136  ;;  %s3833_s30 = smov (!%p3371_p13), 0  }
 0x4e7   : > { %s3837_s6 = smov (!%p3371_p13), 0  }
 0x4eb LB: >> { %v2895_v31 = vld [vmem:[%s3831_s29] sm:$0xff]  ;;  %s2897_s5 = sadd.s32 1, %s3835_s30  ;;  %s2889_s6 = sadd.s32 1, %s3839_s6   ;;  %s3839_s6 = sphi %s3837_s6, %s2889_s6   ;;  %s3835_s30 = sphi %s3833_s30, %s3834_s30   ;;  %s3831_s29 = sphi %s3829_s29, %s2902_s29   ;;  %s3827_s27 = sphi %s3825_s27, %s2903_s27  }
 0x4ec   : >> { %2896 = vst [vmem:[%s3827_s27] sm:$0xff] %v2895_v31  ;;  %p2898_p0 = scmp.ge.s32.totalorder %s2897_s5, %s5533_s20  ;;  %p2888_p1 = scmp.ge.s32.totalorder %s2889_s6, %s5533_s20 }
 0x4ee   : >> { %s5570_s5 = smov (%p2898_p0, %s2897_s5), 0  ;;  %2891 = sbr.rel (!%p2888_p1) target bundleno = 1259 (0x4eb), region = 142 }
 0x4ef   : >> { %s3372_s15 = sshll.u32 %s5570_s5, 3  ;;  %s3834_s30 = smov %s5570_s5  }
 0x4f0   : >> { %s2902_s29 = scalar_lea.vmem %s2883_s25, %s3372_s15 [#allocation2]   ;;  %s2903_s27 = scalar_lea.vmem %s2885_s26, %s3372_s15  }
 0x4f3 PF: > { %p11_p2 = scmp.ge.s32.totalorder %s3881_s19, 4   ;;  %s5562_s15 = smov %s3803_s16 }
 0x4f4   : > { %s5563_s16 = smov %s3889_s22  ;;  %s5564_s17 = smov %s3881_s19 }
 0x4f5   :  { %13 = sbr.rel (!%p11_p2) target bundleno = 2 (0x2), region = 153 }

</bundles_post_ra>
